<compile_context>
chip_gen: v6e
topology: v6e:2x2x1
jax: 0.10.0
libtpu: 0.0.40
codegen_flags: <defaults>
</compile_context>

<pallas_src>
import jax
import jax.numpy as jnp
from jax.experimental import pallas as pl
from jax.experimental.pallas import tpu as pltpu

H1 = 128        # hidden 1
H2 = 64         # hidden 2
TB_MAX = 1024   # max batch tile (VMEM: ~6.5 MiB double-buffered f32 x tile)


def disc_kernel(x_ref, w1_ref, b1_ref, w2_ref, b2_ref, w3_ref, b3_ref, o_ref):
    # Cast the f32 tile to bf16 in-kernel (avoids an extra HBM pass over x).
    xb = x_ref[...].astype(jnp.bfloat16)

    # Layer 1: Linear(img_dim, 128) + LeakyReLU(0.1).  bf16 operands, f32 acc.
    h1 = jnp.dot(xb, w1_ref[...], preferred_element_type=jnp.float32)
    h1 = h1 + b1_ref[...]
    h1 = jnp.where(h1 > 0, h1, 0.1 * h1)

    # Layer 2: Linear(128, 64) + LeakyReLU(0.1).
    h2 = jnp.dot(h1.astype(jnp.bfloat16), w2_ref[...],
                 preferred_element_type=jnp.float32)
    h2 = h2 + b2_ref[...]
    h2 = jnp.where(h2 > 0, h2, 0.1 * h2)

    # Layer 3: Linear(64, 1) + Sigmoid.  Single real output column; sigmoid /
    # store only touch (tb, 1) — minimal EUP work and minimal HBM writeback.
    h3 = jnp.dot(h2.astype(jnp.bfloat16), w3_ref[...],
                 preferred_element_type=jnp.float32)
    h3 = h3 + b3_ref[...]
    o_ref[...] = jax.nn.sigmoid(h3).astype(o_ref.dtype)


def prepare_params(params):
    """One-time weight prep: bf16 weights, 2D f32 bias rows.  Hoisted out of
    the per-call forward path so it is not re-done every training step."""
    w1, b1, w2, b2, w3, b3 = params
    return (w1.astype(jnp.bfloat16), b1.reshape(1, H1).astype(jnp.float32),
            w2.astype(jnp.bfloat16), b2.reshape(1, H2).astype(jnp.float32),
            w3.astype(jnp.bfloat16), b3.reshape(1, 1).astype(jnp.float32))


def _pick_tile(B):
    """Sublane-aligned batch tile, capped at TB_MAX, and (for B > 8) chosen so
    the grid has at least 2 steps — keeps both v7x TensorCores busy."""
    if B <= 8:
        return B                      # block equals full array dim (allowed)
    tb = ((pl.cdiv(B, 2) + 7) // 8) * 8
    return min(TB_MAX, tb)


def discriminator_forward(x, prepared):
    """x: (B, img_dim) float32 (unpadded). Returns (B, 1) float32 in [0, 1]."""
    B, D = x.shape
    w1b, b1r, w2b, b2r, w3b, b3r = prepared

    tb = _pick_tile(B)
    grid = (pl.cdiv(B, tb),)          # ragged last block handled by Mosaic
    full = lambda a: pl.BlockSpec(a.shape, lambda i: (0, 0))

    out = pl.pallas_call(
        disc_kernel,
        out_shape=jax.ShapeDtypeStruct((B, 1), jnp.float32),
        grid_spec=pltpu.PrefetchScalarGridSpec(
            num_scalar_prefetch=0,
            grid=grid,
            in_specs=[
                pl.BlockSpec((tb, D), lambda i: (i, 0)),   # x tile over batch
                full(w1b), full(b1r),
                full(w2b), full(b2r),
                full(w3b), full(b3r),
            ],
            out_specs=pl.BlockSpec((tb, 1), lambda i: (i, 0)),
        ),
        compiler_params=pltpu.CompilerParams(
            dimension_semantics=("parallel",),
            vmem_limit_bytes=32 * 1024 * 1024,
        ),
    )(x, w1b, b1r, w2b, b2r, w3b, b3r)

    return out


def init_params(key, img_dim):
    """PyTorch nn.Linear default init: U(-1/sqrt(fan_in), 1/sqrt(fan_in))."""
    ks = jax.random.split(key, 6)

    def linear(kw, kb, fan_in, fan_out):
        bound = 1.0 / jnp.sqrt(fan_in)
        w = jax.random.uniform(kw, (fan_in, fan_out), jnp.float32, -bound, bound)
        b = jax.random.uniform(kb, (fan_out,), jnp.float32, -bound, bound)
        return w, b

    w1, b1 = linear(ks[0], ks[1], img_dim, H1)
    w2, b2 = linear(ks[2], ks[3], H1, H2)
    w3, b3 = linear(ks[4], ks[5], H2, 1)
    return (w1, b1, w2, b2, w3, b3)


def reference_forward_f32(x, params):
    w1, b1, w2, b2, w3, b3 = params
    h = x @ w1 + b1
    h = jnp.where(h > 0, h, 0.1 * h)
    h = h @ w2 + b2
    h = jnp.where(h > 0, h, 0.1 * h)
    h = h @ w3 + b3
    return jax.nn.sigmoid(h)


def reference_forward_bf16(x, params):
    """Same dtype policy as the kernel: bf16 matmul operands, f32 accumulate."""
    w1, b1, w2, b2, w3, b3 = params
    f = lambda a: a.astype(jnp.bfloat16)
    h = jnp.dot(f(x), f(w1), preferred_element_type=jnp.float32) + b1
    h = jnp.where(h > 0, h, 0.1 * h)
    h = jnp.dot(f(h), f(w2), preferred_element_type=jnp.float32) + b2
    h = jnp.where(h > 0, h, 0.1 * h)
    h = jnp.dot(f(h), f(w3), preferred_element_type=jnp.float32) + b3
    return jax.nn.sigmoid(h)


if __name__ == "__main__":
    key = jax.random.PRNGKey(0)
    k_x, k_p = jax.random.split(key)

    # MNIST-like discriminator input; 200 is deliberately NOT a multiple of the
    # chosen batch tile so the ragged-last-block (masked) path is exercised.
    batch, img_dim = 200, 784
    x = jax.random.normal(k_x, (batch, img_dim), jnp.float32)
    params = init_params(k_p, img_dim)
    prepared = prepare_params(params)   # hoisted: done once, not per call

    fwd = jax.jit(discriminator_forward)
    out = jax.block_until_ready(fwd(x, prepared))

    assert out.shape == (batch, 1)

    ref_bf16 = reference_forward_bf16(x, params)
    ref_f32 = reference_forward_f32(x, params)
    assert jnp.allclose(out, ref_bf16, atol=2e-3, rtol=2e-3), (out[:4], ref_bf16[:4])
    assert jnp.allclose(out, ref_f32, atol=5e-2, rtol=5e-2), (out[:4], ref_f32[:4])

    print("KERNEL_OK")
</pallas_src>

<mosaic_0001>
module attributes {stable_mosaic.version = 11 : i64} {
  func.func @disc_kernel(%arg0: i32, %arg1: memref<104x784xf32, #tpu.memory_space<vmem>>, %arg2: memref<784x128xbf16, #tpu.memory_space<vmem>>, %arg3: memref<1x128xf32, #tpu.memory_space<vmem>>, %arg4: memref<128x64xbf16, #tpu.memory_space<vmem>>, %arg5: memref<1x64xf32, #tpu.memory_space<vmem>>, %arg6: memref<64x1xbf16, #tpu.memory_space<vmem>>, %arg7: memref<1x1xf32, #tpu.memory_space<vmem>>, %arg8: memref<104x1xf32, #tpu.memory_space<vmem>>) attributes {dimension_semantics = [#tpu.dimension_semantics<parallel>], iteration_bounds = array<i64: 2>, scalar_prefetch = 0 : i64, scratch_operands = 0 : i64, tpu.core_type = #tpu.core_type<tc>, window_params = [{transform_indices = @transform_0, window_bounds = array<i64: 104, 784>}, {pipeline_mode = #tpu.pipeline_mode<synchronous>, transform_indices = @transform_1, window_bounds = array<i64: 784, 128>}, {pipeline_mode = #tpu.pipeline_mode<synchronous>, transform_indices = @transform_2, window_bounds = array<i64: 1, 128>}, {pipeline_mode = #tpu.pipeline_mode<synchronous>, transform_indices = @transform_3, window_bounds = array<i64: 128, 64>}, {pipeline_mode = #tpu.pipeline_mode<synchronous>, transform_indices = @transform_4, window_bounds = array<i64: 1, 64>}, {pipeline_mode = #tpu.pipeline_mode<synchronous>, transform_indices = @transform_5, window_bounds = array<i64: 64, 1>}, {pipeline_mode = #tpu.pipeline_mode<synchronous>, transform_indices = @transform_6, window_bounds = array<i64: 1, 1>}, {transform_indices = @transform_7, window_bounds = array<i64: 104, 1>}]} {
    %c0 = arith.constant 0 : index
    %c0_0 = arith.constant 0 : index
    %0 = vector.load %arg1[%c0, %c0_0] : memref<104x784xf32, #tpu.memory_space<vmem>>, vector<104x784xf32>
    %1 = arith.truncf %0 : vector<104x784xf32> to vector<104x784xbf16>
    %c0_1 = arith.constant 0 : index
    %c0_2 = arith.constant 0 : index
    %2 = vector.load %arg2[%c0_1, %c0_2] : memref<784x128xbf16, #tpu.memory_space<vmem>>, vector<784x128xbf16>
    %cst = arith.constant dense<0.000000e+00> : vector<104x128xf32>
    %3 = tpu.matmul %1, %2, %cst {dimension_numbers = #tpu.dot_dimension_numbers<[1], [0], [0], [1], [0, 0, 1, 1], [], []>} : vector<104x784xbf16>, vector<784x128xbf16>, vector<104x128xf32> -> vector<104x128xf32>
    %c0_3 = arith.constant 0 : index
    %c0_4 = arith.constant 0 : index
    %4 = vector.load %arg3[%c0_3, %c0_4] : memref<1x128xf32, #tpu.memory_space<vmem>>, vector<1x128xf32>
    %5 = vector.broadcast %4 : vector<1x128xf32> to vector<104x128xf32>
    %6 = arith.addf %3, %5 : vector<104x128xf32>
    %cst_5 = arith.constant 0.000000e+00 : f32
    %7 = vector.broadcast %cst_5 : f32 to vector<104x128xf32>
    %8 = arith.cmpf ogt, %6, %7 : vector<104x128xf32>
    %cst_6 = arith.constant 1.000000e-01 : f32
    %9 = vector.broadcast %cst_6 : f32 to vector<104x128xf32>
    %10 = arith.mulf %9, %6 : vector<104x128xf32>
    %11 = arith.select %8, %6, %10 : vector<104x128xi1>, vector<104x128xf32>
    %12 = arith.truncf %11 : vector<104x128xf32> to vector<104x128xbf16>
    %c0_7 = arith.constant 0 : index
    %c0_8 = arith.constant 0 : index
    %13 = vector.load %arg4[%c0_7, %c0_8] : memref<128x64xbf16, #tpu.memory_space<vmem>>, vector<128x64xbf16>
    %cst_9 = arith.constant dense<0.000000e+00> : vector<104x64xf32>
    %14 = tpu.matmul %12, %13, %cst_9 {dimension_numbers = #tpu.dot_dimension_numbers<[1], [0], [0], [1], [0, 0, 1, 1], [], []>} : vector<104x128xbf16>, vector<128x64xbf16>, vector<104x64xf32> -> vector<104x64xf32>
    %c0_10 = arith.constant 0 : index
    %c0_11 = arith.constant 0 : index
    %15 = vector.load %arg5[%c0_10, %c0_11] : memref<1x64xf32, #tpu.memory_space<vmem>>, vector<1x64xf32>
    %16 = vector.broadcast %15 : vector<1x64xf32> to vector<104x64xf32>
    %17 = arith.addf %14, %16 : vector<104x64xf32>
    %cst_12 = arith.constant 0.000000e+00 : f32
    %18 = vector.broadcast %cst_12 : f32 to vector<104x64xf32>
    %19 = arith.cmpf ogt, %17, %18 : vector<104x64xf32>
    %cst_13 = arith.constant 1.000000e-01 : f32
    %20 = vector.broadcast %cst_13 : f32 to vector<104x64xf32>
    %21 = arith.mulf %20, %17 : vector<104x64xf32>
    %22 = arith.select %19, %17, %21 : vector<104x64xi1>, vector<104x64xf32>
    %23 = arith.truncf %22 : vector<104x64xf32> to vector<104x64xbf16>
    %c0_14 = arith.constant 0 : index
    %c0_15 = arith.constant 0 : index
    %24 = vector.load %arg6[%c0_14, %c0_15] : memref<64x1xbf16, #tpu.memory_space<vmem>>, vector<64x1xbf16>
    %cst_16 = arith.constant dense<0.000000e+00> : vector<104x1xf32>
    %25 = tpu.matmul %23, %24, %cst_16 {dimension_numbers = #tpu.dot_dimension_numbers<[1], [0], [0], [1], [0, 0, 1, 1], [], []>} : vector<104x64xbf16>, vector<64x1xbf16>, vector<104x1xf32> -> vector<104x1xf32>
    %c0_17 = arith.constant 0 : index
    %c0_18 = arith.constant 0 : index
    %26 = vector.load %arg7[%c0_17, %c0_18] : memref<1x1xf32, #tpu.memory_space<vmem>>, vector<1x1xf32>
    %27 = vector.broadcast %26 : vector<1x1xf32> to vector<104x1xf32>
    %28 = arith.addf %25, %27 : vector<104x1xf32>
    %29 = arith.negf %28 : vector<104x1xf32>
    %30 = math.exp %29 : vector<104x1xf32>
    %cst_19 = arith.constant 1.000000e+00 : f32
    %31 = vector.broadcast %cst_19 : f32 to vector<104x1xf32>
    %32 = arith.addf %31, %30 : vector<104x1xf32>
    %33 = arith.divf %31, %32 : vector<104x1xf32>
    %c0_20 = arith.constant 0 : index
    %c0_21 = arith.constant 0 : index
    %34 = vector.load %arg8[%c0_20, %c0_21] : memref<104x1xf32, #tpu.memory_space<vmem>>, vector<104x1xf32>
    tpu.vector_store %arg8[%c0_20, %c0_21], %33 {strides = array<i32>} : memref<104x1xf32, #tpu.memory_space<vmem>>, vector<104x1xf32>,
    return
  }
  func.func @transform_0(%arg0: i32) -> (i32, i32) {
    %c0_i32 = arith.constant 0 : i32
    %c0_i32_0 = arith.constant 0 : i32
    return %arg0, %c0_i32 : i32, i32
  }
  func.func @transform_1(%arg0: i32) -> (i32, i32) {
    %c0_i32 = arith.constant 0 : i32
    %c0_i32_0 = arith.constant 0 : i32
    %c0_i32_1 = arith.constant 0 : i32
    return %c0_i32, %c0_i32_0 : i32, i32
  }
  func.func @transform_2(%arg0: i32) -> (i32, i32) {
    %c0_i32 = arith.constant 0 : i32
    %c0_i32_0 = arith.constant 0 : i32
    %c0_i32_1 = arith.constant 0 : i32
    return %c0_i32, %c0_i32_0 : i32, i32
  }
  func.func @transform_3(%arg0: i32) -> (i32, i32) {
    %c0_i32 = arith.constant 0 : i32
    %c0_i32_0 = arith.constant 0 : i32
    %c0_i32_1 = arith.constant 0 : i32
    return %c0_i32, %c0_i32_0 : i32, i32
  }
  func.func @transform_4(%arg0: i32) -> (i32, i32) {
    %c0_i32 = arith.constant 0 : i32
    %c0_i32_0 = arith.constant 0 : i32
    %c0_i32_1 = arith.constant 0 : i32
    return %c0_i32, %c0_i32_0 : i32, i32
  }
  func.func @transform_5(%arg0: i32) -> (i32, i32) {
    %c0_i32 = arith.constant 0 : i32
    %c0_i32_0 = arith.constant 0 : i32
    %c0_i32_1 = arith.constant 0 : i32
    return %c0_i32, %c0_i32_0 : i32, i32
  }
  func.func @transform_6(%arg0: i32) -> (i32, i32) {
    %c0_i32 = arith.constant 0 : i32
    %c0_i32_0 = arith.constant 0 : i32
    %c0_i32_1 = arith.constant 0 : i32
    return %c0_i32, %c0_i32_0 : i32, i32
  }
  func.func @transform_7(%arg0: i32) -> (i32, i32) {
    %c0_i32 = arith.constant 0 : i32
    %c0_i32_0 = arith.constant 0 : i32
    return %arg0, %c0_i32 : i32, i32
  }
}

</mosaic_0001>

<bundles_post_ra>
// kernel: discriminator_forward.1
= control target key start
LH: loop header
LB: loop body
LE: loop exit
PB: predicated region body
PF: predicated region fallthrough
CT: control target
= control target key end

     0   :  { %s3514_s0 = inlined_call_operand.hbm [shape: f32[200,784], index: 0, kind: input, shape index: {}]   ;;  %s3515_s1 = inlined_call_operand.hbm [shape: bf16[784,128], index: 1, kind: input, shape index: {}]   ;;  %s3516_s2 = inlined_call_operand.vmem [shape: f32[1,128], index: 2, kind: input, shape index: {}]   ;;  %s3517_s3 = inlined_call_operand.vmem [shape: bf16[128,64], index: 3, kind: input, shape index: {}]   ;;  %s3518_s4 = inlined_call_operand.vmem [shape: f32[1,64], index: 4, kind: input, shape index: {}]   ;;  %s3519_s5 = inlined_call_operand.vmem [shape: bf16[64,1], index: 5, kind: input, shape index: {}]   ;;  %s3520_s6 = inlined_call_operand.<no memory space> [shape: f32[1,1], index: 6, kind: input, shape index: {}]   ;;  %s3521_s7 = inlined_call_operand.vmem [shape: f32[200,1], index: 7, kind: output, shape index: {}]  }
   0x1   :  { %v12_v0 = vstv %s3520_s6 }
   0x2   :  { %13 = vst [vmem:[#allocation2] sm:$0x1] %v12_v0 }
   0x3   :  { %14 = vsyncpa [#allocation4], 0 }
   0x4   :  { %16 = vsyncpa [#allocation4 + $0x1], 0 }
   0x5   :  { %17 = vsyncpa [#allocation6], 0  ;;  %s2899_s26 = smov 0   ;;  %s2901_s27 = smov 0  }
   0x6   :  { %s2903_s28 = smov 0   ;;  %s2905_s29 = smov 0  }
   0x7 LB: > { %s2918_s6 = sadd.s32 4294967295, %s2814_s29   ;;  %s2921_s30 = sadd.s32 1, %s2814_s29   ;;  %s2814_s29 = sphi %s2905_s29, %s3548_s29   ;;  %s2810_s28 = sphi %s2903_s28, %s3547_s28   ;;  %s2806_s27 = sphi %s2901_s27, %s3546_s27   ;;  %s2802_s26 = sphi %s2899_s26, %s3545_s26  }
   0x8   : > { %s27_s8 = ssub.s32 %s2814_s29, %s2921_s30  ;;  %s30_s9 = sadd.s32 1, %s2810_s28 }
   0x9   : > { %p28_p0 = scmp.eq.s32.totalorder %s27_s8, 0  ;;  %p37_p1 = scmp.ne.s32.totalorder %s2810_s28, %s2806_s27 }
   0xa   : > { %p38_p2 = scmp.eq.s32.totalorder %s2814_s29, 0  ;;  %p43_p3 = scmp.ne.s32.totalorder %s2806_s27, %s2802_s26 }
   0xb   : > { %s2931_s10 = scalar_select %p28_p0, %s2810_s28, %s30_s9  }
   0xc   : > { %p2933_p4 = por %p38_p2, %p37_p1  ;;  %p44_p5 = scmp.eq.s32.totalorder %s2918_s6, 0 }
   0xd   : > { %p193_p6 = scmp.eq.s32.totalorder %s2918_s6, 1  ;;  %p2023_p7 = scmp.ge.s32.totalorder %s2814_s29, 1 }
   0xe   : > { %p2942_p8 = por %p44_p5, %p43_p3  ;;  %p206_p9 = scmp.lt.s32.totalorder %s2814_s29, 3 }
   0xf   : > { %p2947_p10 = por %p193_p6, %p37_p1  ;;  %s2848_s15 = smov [#allocation5]  }
  0x10   : > { %s3526_s12 = scalar_select %p2942_p8, 1, 0 }
  0x11   : > { %s3527_s13 = scalar_select %p2947_p10, 1, 0 }
  0x12   : > { %p2951_p11 = pnand %p2023_p7, %p206_p9  ;;  %s218_s16 = sshll.u32 %s2848_s15, 4  ;;  %s219_s16 = int_to_ptr.vmem [resolvable:$true] %s218_s16 }
  0x13   : > { %s2703_s17 = scalar_lea.vmem %s219_s16, 6272  ;;  %p2711_p6 = scmp.lt.s32.totalorder %s219_s16, %s219_s16 }
  0x14   : > { %p2464_p12 = pneg %p2951_p11  ;;  %p2704_p2 = scmp.ne.s32.totalorder %s219_s16, %s2703_s17 }
  0x15   : > { %p2712_p8 = scmp.lt.s32.totalorder %s2703_s17, %s2703_s17 }
  0x16   : > { %p2465_p13 = pnand %p2464_p12, %p44_p5 }
  0x17   : > { %p2713_p10 = por %p2712_p8, %p2711_p6 }
  0x18   : > { %p2694_p0 = pneg %p2465_p13 }
  0x1a   : > { %p2706_p3 = pnand %p2704_p2, %p2694_p0 }
  0x1c   : > { %p2707_p1 = pneg %p2706_p3 }
  0x1e   : > { %p2714_p7 = pnand %p2713_p10, %p2707_p1 }
  0x20   : > { %2717 = shalt.err (!%p2714_p7)
}
  0x21   : > { %s2849_s18 = smov 64   ;;  %s2850_s19 = smov 4  }
  0x22   : > { %2467 = dma.hbm_to_vmem [thread:$0]  (!%p2465_p13), %s3515_s1, 6272, %s219_s16, [#allocation6], %s2849_s18, %s2849_s18, %s2850_s19  }
  0x23   : > { %p2025_p9 = scmp.ge.s32.totalorder %s2814_s29, 2 }
  0x25   : > { %243 = sbr.rel (%p2025_p9) target bundleno = 77 (0x4d), region = 40 }
  0x2a   : > { %246 = sbr.rel (!%p2933_p4) target bundleno = 77 (0x4d), region = 44  ;;  %s247_s22 = sand.u32 (%p2933_p4), 1, %s2810_s28  }
  0x2b   : > { %s252_s23 = smul.u32 (%p2933_p4), 13, %s2814_s29  ;;  %s2970_s9 = scalar_lea.sflag (%p2933_p4), [#allocation4], %s247_s22 }
  0x2c   : > { %s2455_s24 = smul.u32 (%p2933_p4), 728, %s247_s22 }
  0x2d   : > { %s253_s25 = ssub.s32 (%p2933_p4), 25, %s252_s23 }
  0x2e   : > { %p254_p8 = scmp.lt.s32.totalorder (%p2933_p4), %s253_s25, 13  ;;  %s251_s15 = scalar_lea.vmem (%p2933_p4), [#allocation3], %s2455_s24 }
  0x30   : > { %s3550_s25 = smov (!%p254_p8, %s253_s25), 13 }
  0x31   : > { %s2967_s26 = smul.u32 896, %s3550_s25 }
  0x33   : > { %s259_s8 = ssub.s32 11648, %s2967_s26 }
  0x34   : > { %260 = vsyncadd %s2970_s9, %s259_s8  ;;  %p2028_p4 = scmp.ne.s32.totalorder %s2967_s26, 0  ;;  %s2469_s11 = smul.u32 11648, %s2814_s29 }
  0x35   : > { %s266_s16 = sshll.u32 %s251_s15, 4  ;;  %s2722_s29 = scalar_lea.hbm %s3514_s0, 22400  ;;  %s2980_s16 = int_to_ptr.vmem [resolvable:$true] %s266_s16 }
  0x36   : > { %s2978_s19 = scalar_lea.hbm %s3514_s0, %s2469_s11 }
  0x37   : > { %s2718_s20 = scalar_lea.hbm %s2978_s19, %s2967_s26  ;;  %p2723_p0 = scmp.lt.s32.totalorder %s2978_s19, %s3514_s0 }
  0x38   : > { %p2719_p10 = scmp.ne.s32.totalorder %s2978_s19, %s2718_s20  ;;  %p2724_p2 = scmp.lt.s32.totalorder %s2722_s29, %s2718_s20 }
  0x3a   : > { %p2720_p12 = pnand %p2719_p10, %p2028_p4  ;;  %p2725_p3 = por %p2724_p2, %p2723_p0 }
  0x3c   : > { %p2721_p13 = pneg %p2720_p12 }
  0x3e   : > { %p2726_p1 = pnand %p2725_p3, %p2721_p13 }
  0x40   : > { %2729 = shalt.err (!%p2726_p1)
}
  0x41   : > { %s2730_s25 = scalar_lea.vmem %s2980_s16, %s2967_s26  ;;  %s2851_s8 = smov [#allocation3]  }
  0x42   : > { %p2731_p6 = scmp.ne.s32.totalorder %s2980_s16, %s2730_s25  ;;  %s2734_s15 = sshll.u32 %s2851_s8, 4  ;;  %s2735_s15 = int_to_ptr.vmem [resolvable:$false] %s2734_s15 }
  0x43   : > { %s2736_s11 = scalar_lea.vmem %s2735_s15, 23296  ;;  %p2737_p8 = scmp.lt.s32.totalorder %s2980_s16, %s2735_s15 }
  0x44   : > { %p2732_p7 = pnand %p2731_p6, %p2028_p4  ;;  %p2738_p10 = scmp.lt.s32.totalorder %s2736_s11, %s2730_s25 }
  0x46   : > { %p2733_p9 = pneg %p2732_p7  ;;  %p2739_p12 = por %p2738_p10, %p2737_p8 }
  0x48   : > { %p2740_p0 = pnand %p2739_p12, %p2733_p9 }
  0x4a   : > { %2743 = shalt.err (!%p2740_p0)
}
  0x4b   : > { %s2852_s17 = smov 896   ;;  %s2853_s18 = smov 56  }
  0x4c   : > { %272 = dma.hbm_to_vmem [thread:$0]  (%p2028_p4), %s2978_s19, %s2967_s26, %s2980_s16, %s2970_s9, %s2852_s17, %s2852_s17, %s2853_s18  }
  0x4d PF: > { %278 = sbr.rel (%p2951_p11) target bundleno = 922 (0x39a), region = 48 }
  0x52   : > { %s3009_s20 = sand.u32 1, %s2806_s27   ;;  %p3529_p13 = scmp.ne.s32.totalorder %s3526_s12, 0 }
  0x53   : > { %s2457_s21 = smul.u32 728, %s3009_s20  ;;  %s281_s22 = scalar_lea.sflag [#allocation4], %s3009_s20 }
  0x55   : > { %s3013_s29 = scalar_lea.vmem [#allocation3], %s2457_s21 }
  0x56   : > { %2793 = dma.done.wait (%p3529_p13), %s281_s22, 11648  }
  0x57   : > { %2795 = vsyncadd (%p3529_p13), %s281_s22, 4294955648 }
  0x58   : > { %2797 = dma.done.wait (%p44_p5), [#allocation6], 6272  }
  0x59   : > { %2799 = vsyncadd (%p44_p5), [#allocation6], 4294961024  ;;  %v2575_v1 = vld [vmem:[#allocation5 + $0x78] sm:$0xff]   ;;  %v2579_v5 = vld [vmem:[#allocation5 + $0x70] sm:$0xff]   ;;  %v3523_v43 = vmov 0.0   ;;  %vm2855_vm0 = vmmov 0  }
  0x5a   : > { %v2576_v2 = vld [vmem:[#allocation5 + $0x38] sm:$0xff]   ;;  %2137 = vmatprep.subr.bf16.mxu0 %v2575_v1  ;;  %v2580_v6 = vld [vmem:[#allocation5 + $0x30] sm:$0xff]   ;;  %v2583_v9 = vld [vmem:[#allocation5 + $0x68] sm:$0xff]   ;;  %vm869_vm1 = vcmask 130048   ;;  %s2458_s11 = smul.u32 104, %s3009_s20  ;;  %p3541_p5 = scmp.ne.s32.totalorder %s3527_s13, 0 }
  0x5b   : > { %v2577_v3 = vld [vmem:[#allocation5 + $0xf8] sm:$0xff]   ;;  %2138 = vmatpush3.bf16.msra.mxu0 %v2576_v2  ;;  %v2581_v7 = vld [vmem:[#allocation5 + $0xf0] sm:$0xff]   ;;  %v2584_v10 = vld [vmem:[#allocation5 + $0x28] sm:$0xff]   ;;  %s1742_s20 = smul.u32 (%p3541_p5), 13, %s2918_s6 }
  0x5c   : > { %v2578_v4 = vld [vmem:[#allocation5 + $0xb8] sm:$0xff]   ;;  %2195 = vmatprep.subr.bf16.mxu1 %v2577_v3  ;;  %2139 = vmatprep.subr.bf16.mxu0 %v2579_v5  ;;  %v2582_v8 = vld [vmem:[#allocation5 + $0xb0] sm:$0xff]   ;;  %v2585_v11 = vld [vmem:[#allocation5 + $0xe8] sm:$0xff]   ;;  %s3390_s17 = scalar_lea.vmem [#allocation7], %s2458_s11   ;;  %s2136_s18 = smul.u32 (%p3541_p5), 104, %s2918_s6 }
  0x5d   : > { %2196 = vmatpush3.bf16.msra.mxu1 %v2578_v4  ;;  %v2586_v12 = vld [vmem:[#allocation5 + $0xa8] sm:$0xff]   ;;  %v2587_v13 = vld [vmem:[#allocation5 + $0x60] sm:$0xff]   ;;  %v2591_v17 = vld [vmem:[#allocation5 + $0x58] sm:$0xff]   ;;  %s1743_s21 = ssub.s32 (%p3541_p5), 25, %s1742_s20 }
  0x5e   : > { %2197 = vmatprep.subr.bf16.mxu1 %v2581_v7  ;;  %v2588_v14 = vld [vmem:[#allocation5 + $0x20] sm:$0xff]   ;;  %v2592_v18 = vld [vmem:[#allocation5 + $0x18] sm:$0xff]   ;;  %v2595_v21 = vld [vmem:[#allocation5 + $0x50] sm:$0xff]   ;;  %p1744_p11 = scmp.lt.s32.totalorder (%p3541_p5), %s1743_s21, 13  ;;  %s3429_s12 = scalar_lea.vmem (%p3541_p5), %s3521_s7, %s2136_s18  }
  0x5f   : > { %2140 = vmatpush3.bf16.msra.mxu0 %v2580_v6  ;;  %v2589_v15 = vld [vmem:[#allocation5 + $0xe0] sm:$0xff]   ;;  %v2593_v19 = vld [vmem:[#allocation5 + $0xd8] sm:$0xff]   ;;  %v2596_v22 = vld [vmem:[#allocation5 + $0x10] sm:$0xff]  }
  0x60   : > { %2141 = vmatprep.subr.bf16.mxu0 %v2583_v9  ;;  %v2590_v16 = vld [vmem:[#allocation5 + $0xa0] sm:$0xff]   ;;  %v2594_v20 = vld [vmem:[#allocation5 + $0x98] sm:$0xff]   ;;  %v2597_v23 = vld [vmem:[#allocation5 + $0xd0] sm:$0xff]  }
  0x61   : > { %2198 = vmatpush3.bf16.msra.mxu1 %v2582_v8  ;;  %v2598_v24 = vld [vmem:[#allocation5 + $0x90] sm:$0xff]   ;;  %v2599_v25 = vld [vmem:[#allocation5 + $0x48] sm:$0xff]   ;;  %v2603_v29 = vld [vmem:[#allocation5 + $0x40] sm:$0xff]  }
  0x62   : > { %2199 = vmatprep.subr.bf16.mxu1 %v2585_v11  ;;  %v2600_v26 = vld [vmem:[#allocation5 + $0x8] sm:$0xff]   ;;  %v2604_v30 = vld [vmem:[#allocation5] sm:$0xff]   ;;  %v331_v33 = vld [vmem:[%s3013_s29 + $0x8] sm:$0xff] }
  0x63   : > { %2142 = vmatpush3.bf16.msra.mxu0 %v2584_v10  ;;  %v2601_v27 = vld [vmem:[#allocation5 + $0xc8] sm:$0xff]   ;;  %v2605_v31 = vld [vmem:[#allocation5 + $0xc0] sm:$0xff]   ;;  %v2607_v42 = vld [vmem:[#allocation5 + $0x178] sm:$0xff]  }
  0x64   : > { %2143 = vmatprep.subr.bf16.mxu0 %v2587_v13  ;;  %v2602_v28 = vld [vmem:[#allocation5 + $0x88] sm:$0xff]   ;;  %v2606_v32 = vld [vmem:[#allocation5 + $0x80] sm:$0xff]   ;;  %v339_v45 = vld [vmem:[%s3013_s29 + $0x48] sm:$0xff] }
  0x65   : > { %2200 = vmatpush3.bf16.msra.mxu1 %v2586_v12  ;;  %v338_v34 = vld [vmem:[%s3013_s29 + $0x40] sm:$0xff]  ;;  %v337_v37 = vld [vmem:[%s3013_s29 + $0x38] sm:$0xff]  ;;  %v340_v39 = vld [vmem:[%s3013_s29 + $0x50] sm:$0xff] }
  0x66   : > { %2201 = vmatprep.subr.bf16.mxu1 %v2589_v15  ;;  %v330_v35 = vld [vmem:[%s3013_s29] sm:$0xff]  ;;  %v422_v36 = vpack.c.bf16 %v338_v34, %v331_v33  ;;  %v333_v38 = vld [vmem:[%s3013_s29 + $0x18] sm:$0xff]  ;;  %v332_v44 = vld [vmem:[%s3013_s29 + $0x10] sm:$0xff] }
  0x67   : > { %2144 = vmatpush3.bf16.msra.mxu0 %v2588_v14  ;;  %v421_v40 = vpack.c.bf16 %v337_v37, %v330_v35  ;;  %v424_v41 = vpack.c.bf16 %v340_v39, %v333_v38  ;;  %v423_v46 = vpack.c.bf16 %v339_v45, %v332_v44  ;;  %v2608_v47 = vld [vmem:[#allocation5 + $0x138] sm:$0xff]   ;;  %v345_v48 = vld [vmem:[%s3013_s29 + $0x78] sm:$0xff]  ;;  %v2609_v51 = vld [vmem:[#allocation5 + $0x170] sm:$0xff]  }
  0x68   : > { %2145 = vmatprep.subr.bf16.mxu0 %v2591_v17  ;;  %923 = vmatprep.mubr.bf16.mxu0 %v422_v36  ;;  %v352_v49 = vld [vmem:[%s3013_s29 + $0xb0] sm:$0xff]  ;;  %v351_v54 = vld [vmem:[%s3013_s29 + $0xa8] sm:$0xff]  ;;  %v354_v57 = vld [vmem:[%s3013_s29 + $0xc0] sm:$0xff] }
  0x69   : > { %2202 = vmatpush3.bf16.msra.mxu1 %v2590_v16  ;;  %1011 = vmatprep.mubr.bf16.mxu1 %v424_v41  ;;  %v429_v50 = vpack.c.bf16 %v352_v49, %v345_v48  ;;  %v2610_v52 = vld [vmem:[#allocation5 + $0x180] sm:$0xff]   ;;  %v347_v56 = vld [vmem:[%s3013_s29 + $0x88] sm:$0xff]  ;;  %v346_v60 = vld [vmem:[%s3013_s29 + $0x80] sm:$0xff] }
  0x6a   : > { %2203 = vmatprep.subr.bf16.mxu1 %v2593_v19  ;;  %v344_v53 = vld [vmem:[%s3013_s29 + $0x70] sm:$0xff]  ;;  %v431_v58 = vpack.c.bf16 %v354_v57, %v347_v56  ;;  %v2611_v59 = vld [vmem:[#allocation5 + $0x130] sm:$0xff]   ;;  %v353_v61 = vld [vmem:[%s3013_s29 + $0xb8] sm:$0xff] }
  0x6b   : > { %2146 = vmatpush3.bf16.msra.mxu0 %v2592_v18  ;;  %v428_v55 = vpack.c.bf16 %v351_v54, %v344_v53  ;;  %v430_v62 = vpack.c.bf16 %v353_v61, %v346_v60  ;;  %v2612_v63 = vld [vmem:[#allocation5 + $0x168] sm:$0xff]   ;;  %v359_v0 = vld [vmem:[%s3013_s29 + $0xe8] sm:$0xff]  ;;  %v368_v7 = vld [vmem:[%s3013_s29 + $0x130] sm:$0xff] }
  0x6c   : > { %2147 = vmatprep.subr.bf16.mxu0 %v2595_v21  ;;  %v366_v1 = vld [vmem:[%s3013_s29 + $0x120] sm:$0xff]  ;;  %v365_v5 = vld [vmem:[%s3013_s29 + $0x118] sm:$0xff]  ;;  %v360_v8 = vld [vmem:[%s3013_s29 + $0xf0] sm:$0xff] }
  0x6d   : > { %2204 = vmatpush3.bf16.msra.mxu1 %v2594_v20  ;;  %v436_v2 = vpack.c.bf16 %v366_v1, %v359_v0  ;;  %v2613_v3 = vld [vmem:[#allocation5 + $0x128] sm:$0xff]   ;;  %v367_v9 = vld [vmem:[%s3013_s29 + $0x128] sm:$0xff]  ;;  %v2614_v11 = vld [vmem:[#allocation5 + $0x160] sm:$0xff]  }
  0x6e   : > { %2205 = vmatprep.subr.bf16.mxu1 %v2597_v23  ;;  %v358_v4 = vld [vmem:[%s3013_s29 + $0xe0] sm:$0xff]  ;;  %v361_v6 = vld [vmem:[%s3013_s29 + $0xf8] sm:$0xff]  ;;  %v380_v15 = vld [vmem:[%s3013_s29 + $0x190] sm:$0xff]  ;;  %v437_v16 = vpack.c.bf16 %v367_v9, %v360_v8 }
  0x6f   : > { %2148 = vmatpush3.bf16.msra.mxu0 %v2596_v22  ;;  %v438_v10 = vpack.c.bf16 %v368_v7, %v361_v6  ;;  %v435_v12 = vpack.c.bf16 %v365_v5, %v358_v4  ;;  %v2615_v13 = vld [vmem:[#allocation5 + $0x120] sm:$0xff]   ;;  %v375_v18 = vld [vmem:[%s3013_s29 + $0x168] sm:$0xff]  ;;  %v382_v19 = vld [vmem:[%s3013_s29 + $0x1a0] sm:$0xff] }
  0x70   : > { %2149 = vmatprep.subr.bf16.mxu0 %v2599_v25  ;;  %v373_v14 = vld [vmem:[%s3013_s29 + $0x158] sm:$0xff]  ;;  %v372_v20 = vld [vmem:[%s3013_s29 + $0x150] sm:$0xff]  ;;  %v445_v21 = vpack.c.bf16 %v382_v19, %v375_v18  ;;  %v379_v23 = vld [vmem:[%s3013_s29 + $0x188] sm:$0xff] }
  0x71   : > { %2206 = vmatpush3.bf16.msra.mxu1 %v2598_v24  ;;  %v443_v17 = vpack.c.bf16 %v380_v15, %v373_v14  ;;  %v2616_v22 = vld [vmem:[#allocation5 + $0x158] sm:$0xff]   ;;  %v2618_v33 = vld [vmem:[#allocation5 + $0x150] sm:$0xff]   ;;  %v393_v38 = vld [vmem:[%s3013_s29 + $0x1f8] sm:$0xff] }
  0x72   : > { %2207 = vmatprep.subr.bf16.mxu1 %v2601_v27  ;;  %v2617_v24 = vld [vmem:[#allocation5 + $0x118] sm:$0xff]   ;;  %v374_v27 = vld [vmem:[%s3013_s29 + $0x160] sm:$0xff]  ;;  %v401_v39 = vld [vmem:[%s3013_s29 + $0x238] sm:$0xff] }
  0x73   : > { %2150 = vmatpush3.bf16.msra.mxu0 %v2600_v26  ;;  %v387_v25 = vld [vmem:[%s3013_s29 + $0x1c8] sm:$0xff]  ;;  %v394_v26 = vld [vmem:[%s3013_s29 + $0x200] sm:$0xff]  ;;  %v388_v44 = vld [vmem:[%s3013_s29 + $0x1d0] sm:$0xff] }
  0x74   : > { %2151 = vmatprep.subr.bf16.mxu0 %v2603_v29  ;;  %v389_v29 = vld [vmem:[%s3013_s29 + $0x1d8] sm:$0xff]  ;;  %v2619_v35 = vld [vmem:[#allocation5 + $0x110] sm:$0xff]   ;;  %v400_v54 = vld [vmem:[%s3013_s29 + $0x230] sm:$0xff] }
  0x75   : > { %2208 = vmatpush3.bf16.msra.mxu1 %v2602_v28  ;;  %v381_v28 = vld [vmem:[%s3013_s29 + $0x198] sm:$0xff]  ;;  %v386_v36 = vld [vmem:[%s3013_s29 + $0x1c0] sm:$0xff]  ;;  %v395_v45 = vld [vmem:[%s3013_s29 + $0x208] sm:$0xff] }
  0x76   : > { %2209 = vmatprep.subr.bf16.mxu1 %v2605_v31  ;;  %v396_v31 = vld [vmem:[%s3013_s29 + $0x210] sm:$0xff]  ;;  %v444_v34 = vpack.c.bf16 %v381_v28, %v374_v27  ;;  %v2620_v41 = vld [vmem:[#allocation5 + $0x148] sm:$0xff]   ;;  %v415_v56 = vld [vmem:[%s3013_s29 + $0x2a8] sm:$0xff] }
  0x77   : > { %2152 = vmatpush3.bf16.msra.mxu0 %v2604_v30  ;;  %v442_v30 = vpack.c.bf16 %v379_v23, %v372_v20  ;;  %v452_v37 = vpack.c.bf16 %v396_v31, %v389_v29  ;;  %v410_v48 = vld [vmem:[%s3013_s29 + $0x280] sm:$0xff]  ;;  %v417_v60 = vld [vmem:[%s3013_s29 + $0x2b8] sm:$0xff]  ;;  %v464_v61 = vpack.c.bf16 %v415_v56, %v415_v56  ;;  %v335_v1 = vld [vmem:[%s3013_s29 + $0x28] sm:$0xff] }
  0x78   : > { %2253 = vmatprep.subr.bf16.mxu0 %v2607_v42  ;;  %v2621_v42 = vld [vmem:[#allocation5 + $0x108] sm:$0xff]   ;;  %v363_v18 = vld [vmem:[%s3013_s29 + $0x108] sm:$0xff]  ;;  %v384_v28 = vld [vmem:[%s3013_s29 + $0x1b0] sm:$0xff] }
  0x79   : > { %2210 = vmatpush3.bf16.msra.mxu1 %v2606_v32  ;;  %v450_v32 = vpack.c.bf16 %v394_v26, %v387_v25  ;;  %v402_v57 = vld [vmem:[%s3013_s29 + $0x240] sm:$0xff]  ;;  %v341_v8 = vld [vmem:[%s3013_s29 + $0x58] sm:$0xff]  ;;  %v364_v29 = vld [vmem:[%s3013_s29 + $0x110] sm:$0xff] }
  0x7a   : > { %2345 = vmatprep.subr.bf16.mxu1 %v3523_v43  ;;  %924 = vmatmul.mubr.bf16.vlgmr.msra.gmra.mxu0 %v421_v40  ;;  %v408_v40 = vld [vmem:[%s3013_s29 + $0x270] sm:$0xff]  ;;  %v414_v0 = vld [vmem:[%s3013_s29 + $0x2a0] sm:$0xff]  ;;  %v349_v9 = vld [vmem:[%s3013_s29 + $0x98] sm:$0xff] }
  0x7b   : > { %2254 = vmatpush3.bf16.msra.mxu0 %v2608_v47  ;;  %931 = vmatprep.mubr.bf16.mxu0 %v429_v50  ;;  %v449_v47 = vpack.c.bf16 %v393_v38, %v386_v36  ;;  %v457_v49 = vpack.c.bf16 %v408_v40, %v401_v39  ;;  %v2622_v50 = vld [vmem:[#allocation5 + $0x140] sm:$0xff]   ;;  %v463_v4 = vpack.c.bf16 %v414_v0, %v414_v0  ;;  %v334_v7 = vld [vmem:[%s3013_s29 + $0x20] sm:$0xff]  ;;  %v391_v36 = vld [vmem:[%s3013_s29 + $0x1e8] sm:$0xff] }
  0x7c   : > { %1012 = vmatmul.mubr.bf16.vlgmr.msra.gmra.mxu1 %v423_v46  ;;  %2255 = vmatprep.subr.bf16.mxu0 %v2609_v51  ;;  %v403_v46 = vld [vmem:[%s3013_s29 + $0x248] sm:$0xff]  ;;  %v451_v51 = vpack.c.bf16 %v395_v45, %v388_v44  ;;  %v370_v19 = vld [vmem:[%s3013_s29 + $0x140] sm:$0xff]  ;;  %v369_v26 = vld [vmem:[%s3013_s29 + $0x138] sm:$0xff] }
  0x7d   : > { %2346 = vmatpush3.bf16.msra.mxu1 %v2610_v52  ;;  %1019 = vmatprep.mubr.bf16.mxu1 %v431_v58  ;;  %v2623_v52 = vld [vmem:[#allocation5 + $0x100] sm:$0xff]   ;;  %v459_v53 = vpack.c.bf16 %v410_v48, %v403_v46  ;;  %v350_v20 = vld [vmem:[%s3013_s29 + $0xa0] sm:$0xff]  ;;  %v440_v23 = vpack.c.bf16 %v370_v19, %v363_v18  ;;  %v419_v56 = vld [vmem:[%s3013_s29 + $0x2c8] sm:$0xff] }
  0x7e   : > { %2419 = vmatprep.subr.bf16.mxu1 %v3523_v43  ;;  %v409_v58 = vld [vmem:[%s3013_s29 + $0x278] sm:$0xff]  ;;  %v362_v25 = vld [vmem:[%s3013_s29 + $0x100] sm:$0xff]  ;;  %v392_v48 = vld [vmem:[%s3013_s29 + $0x1f0] sm:$0xff] }
  0x7f   : > { %2256 = vmatpush3.bf16.msra.mxu0 %v2611_v59  ;;  %v377_v27 = vld [vmem:[%s3013_s29 + $0x178] sm:$0xff]  ;;  %v439_v31 = vpack.c.bf16 %v369_v26, %v362_v25  ;;  %v378_v38 = vld [vmem:[%s3013_s29 + $0x180] sm:$0xff]  ;;  %v420_v0 = vld [vmem:[%s3013_s29 + $0x2d0] sm:$0xff] }
  0x80   : > { %2257 = vmatprep.subr.bf16.mxu0 %v2612_v63  ;;  %v466_v63 = vpack.c.bf16 %v417_v60, %v417_v60  ;;  %v385_v39 = vld [vmem:[%s3013_s29 + $0x1b8] sm:$0xff]  ;;  %v390_v44 = vld [vmem:[%s3013_s29 + $0x1e0] sm:$0xff]  ;;  %v468_v60 = vpack.c.bf16 %v419_v56, %v419_v56 }
  0x81   : > { %v397_v45 = vld [vmem:[%s3013_s29 + $0x218] sm:$0xff] }
  0x82   : > { %932 = vmatmul.mubr.bf16.gmra.mxu0 %v428_v55  ;;  %v407_v55 = vld [vmem:[%s3013_s29 + $0x268] sm:$0xff]  ;;  %v405_v46 = vld [vmem:[%s3013_s29 + $0x258] sm:$0xff] }
  0x83   : > { %939 = vmatprep.mubr.bf16.mxu0 %v436_v2  ;;  %2258 = vmatpush3.bf16.msra.mxu0 %v2613_v3  ;;  %v456_v59 = vpack.c.bf16 %v407_v55, %v400_v54  ;;  %v342_v2 = vld [vmem:[%s3013_s29 + $0x60] sm:$0xff]  ;;  %v416_v3 = vld [vmem:[%s3013_s29 + $0x2b0] sm:$0xff]  ;;  %v411_v55 = vld [vmem:[%s3013_s29 + $0x288] sm:$0xff] }
  0x84   : > { %1020 = vmatmul.mubr.bf16.gmra.mxu1 %v430_v62  ;;  %2259 = vmatprep.subr.bf16.mxu0 %v2614_v11  ;;  %v458_v62 = vpack.c.bf16 %v409_v58, %v402_v57  ;;  %v426_v5 = vpack.c.bf16 %v342_v2, %v335_v1  ;;  %v465_v6 = vpack.c.bf16 %v416_v3, %v416_v3  ;;  %v336_v11 = vld [vmem:[%s3013_s29 + $0x30] sm:$0xff]  ;;  %v406_v57 = vld [vmem:[%s3013_s29 + $0x260] sm:$0xff]  ;;  %v413_v58 = vld [vmem:[%s3013_s29 + $0x298] sm:$0xff] }
  0x85   : > { %1027 = vmatprep.mubr.bf16.mxu1 %v438_v10  ;;  %v356_v10 = vld [vmem:[%s3013_s29 + $0xd0] sm:$0xff]  ;;  %v469_v3 = vpack.c.bf16 %v420_v0, %v420_v0 }
  0x86   : > { %v433_v14 = vpack.c.bf16 %v356_v10, %v349_v9  ;;  %v404_v54 = vld [vmem:[%s3013_s29 + $0x250] sm:$0xff] }
  0x87   : > { %2260 = vmatpush3.bf16.msra.mxu0 %v2615_v13  ;;  %v425_v13 = vpack.c.bf16 %v341_v8, %v334_v7  ;;  %v2626_v1 = vld [vmem:[%s3517_s3 + $0x28] sm:$0xff]   ;;  %v2631_v8 = vld [vmem:[%s3517_s3] sm:$0xff]   ;;  %v2632_v9 = vld [vmem:[%s3519_s5 + $0x18] sm:$0xff]  }
  0x88   : > { %2261 = vmatprep.subr.bf16.mxu0 %v2616_v22  ;;  %v2630_v7 = vld [vmem:[%s3517_s3 + $0x8] sm:$0xff]   ;;  %v2633_v10 = vld [vmem:[%s3519_s5 + $0x10] sm:$0xff]  }
  0x8a   : > { %940 = vmatmul.mubr.bf16.gmra.mxu0 %v435_v12  ;;  %v343_v12 = vld [vmem:[%s3013_s29 + $0x68] sm:$0xff] }
  0x8b   : > { %947 = vmatprep.mubr.bf16.mxu0 %v443_v17  ;;  %2262 = vmatpush3.bf16.msra.mxu0 %v2617_v24  ;;  %v427_v15 = vpack.c.bf16 %v343_v12, %v336_v11  ;;  %v355_v17 = vld [vmem:[%s3013_s29 + $0xc8] sm:$0xff] }
  0x8c   : > { %1028 = vmatmul.mubr.bf16.gmra.mxu1 %v437_v16  ;;  %2263 = vmatprep.subr.bf16.mxu0 %v2618_v33  ;;  %v348_v16 = vld [vmem:[%s3013_s29 + $0x90] sm:$0xff] }
  0x8d   : > { %1035 = vmatprep.mubr.bf16.mxu1 %v445_v21  ;;  %v357_v21 = vld [vmem:[%s3013_s29 + $0xd8] sm:$0xff]  ;;  %v432_v22 = vpack.c.bf16 %v355_v17, %v348_v16  ;;  %v2634_v12 = vld [vmem:[%s3519_s5 + $0x8] sm:$0xff]  }
  0x8e   : > { %v434_v24 = vpack.c.bf16 %v357_v21, %v350_v20  ;;  %v2635_v17 = vld [vmem:[%s3519_s5] sm:$0xff]  }
  0x8f   : > { %2264 = vmatpush3.bf16.msra.mxu0 %v2619_v35  ;;  %v383_v35 = vld [vmem:[%s3013_s29 + $0x1a8] sm:$0xff] }
  0x90   : > { %2265 = vmatprep.subr.bf16.mxu0 %v2620_v41 }
  0x92   : > { %948 = vmatmul.mubr.bf16.gmra.mxu0 %v442_v30  ;;  %v371_v30 = vld [vmem:[%s3013_s29 + $0x148] sm:$0xff] }
  0x93   : > { %955 = vmatprep.mubr.bf16.mxu0 %v450_v32  ;;  %2266 = vmatpush3.bf16.msra.mxu0 %v2621_v42  ;;  %v447_v32 = vpack.c.bf16 %v384_v28, %v377_v27  ;;  %v441_v33 = vpack.c.bf16 %v371_v30, %v364_v29  ;;  %v448_v42 = vpack.c.bf16 %v385_v39, %v378_v38 }
  0x94   : > { %1036 = vmatmul.mubr.bf16.gmra.mxu1 %v444_v34  ;;  %2267 = vmatprep.subr.bf16.mxu0 %v2622_v50  ;;  %v376_v34 = vld [vmem:[%s3013_s29 + $0x170] sm:$0xff]  ;;  %v453_v50 = vpack.c.bf16 %v397_v45, %v390_v44 }
  0x95   : > { %1043 = vmatprep.mubr.bf16.mxu1 %v452_v37  ;;  %v398_v37 = vld [vmem:[%s3013_s29 + $0x220] sm:$0xff]  ;;  %v446_v40 = vpack.c.bf16 %v383_v35, %v376_v34 }
  0x96   : > { %v454_v41 = vpack.c.bf16 %v398_v37, %v391_v36 }
  0x97   : > { %2268 = vmatpush3.bf16.msra.mxu0 %v2623_v52 }
  0x98   : > { %2375 = vmatprep.subr.bf16.mxu0 %v3523_v43 }
  0x9a   : > { %956 = vmatmul.mubr.bf16.gmra.mxu0 %v449_v47  ;;  %v412_v47 = vld [vmem:[%s3013_s29 + $0x290] sm:$0xff] }
  0x9b   : > { %963 = vmatprep.mubr.bf16.mxu0 %v457_v49  ;;  %v399_v49 = vld [vmem:[%s3013_s29 + $0x228] sm:$0xff] }
  0x9c   : > { %1044 = vmatmul.mubr.bf16.gmra.mxu1 %v451_v51  ;;  %v461_v51 = vpack.c.bf16 %v412_v47, %v405_v46  ;;  %v455_v52 = vpack.c.bf16 %v399_v49, %v392_v48 }
  0x9d   : > { %1051 = vmatprep.mubr.bf16.mxu1 %v459_v53  ;;  %v2624_v53 = vld [vmem:[%s3517_s3 + $0x38] sm:$0xff]  }
  0xa2   : > { %964 = vmatmul.mubr.bf16.gmra.mxu0 %v456_v59  ;;  %v460_v59 = vpack.c.bf16 %v411_v55, %v404_v54 }
  0xa3   : > { %971 = vmatprep.mubr.bf16.mxu0 %v464_v61  ;;  %v2625_v61 = vld [vmem:[%s3517_s3 + $0x30] sm:$0xff]  }
  0xa4   : > { %1052 = vmatmul.mubr.bf16.gmra.mxu1 %v458_v62  ;;  %v462_v62 = vpack.c.bf16 %v413_v58, %v406_v57 }
  0xa5   : > { %1059 = vmatprep.mubr.bf16.mxu1 %v466_v63  ;;  %v418_v63 = vld [vmem:[%s3013_s29 + $0x2c0] sm:$0xff] }
  0xa6   : > { %v467_v2 = vpack.c.bf16 %v418_v63, %v418_v63 }
  0xaa   : > { %972 = vmatmul.mubr.bf16.gmra.mxu0 %v463_v4  ;;  %v2627_v4 = vld [vmem:[%s3517_s3 + $0x20] sm:$0xff]  }
  0xab   : > { %1099 = vmatprep.mubr.bf16.mxu0 %v426_v5  ;;  %v2628_v5 = vld [vmem:[%s3517_s3 + $0x18] sm:$0xff]  }
  0xac   : > { %1060 = vmatmul.mubr.bf16.gmra.mxu1 %v465_v6  ;;  %v2629_v6 = vld [vmem:[%s3517_s3 + $0x10] sm:$0xff]  }
  0xad   : > { %2347 = vmatprep.mubr.msk.bf16.mxu1 %vm2855_vm0, %v3523_v43 }
  0xb2   : > { %1100 = vmatmul.mubr.bf16.vlgmr.msra.gmra.mxu0 %v425_v13 }
  0xb3   : > { %1107 = vmatprep.mubr.bf16.mxu0 %v433_v14  ;;  %2376 = vmatpush3.bf16.msra.mxu0 %v2624_v53 }
  0xb4   : > { %2348 = vmatmul.mubr.msk.bf16.vlgmr.msra.gmra.mxu1 %vm869_vm1, %v427_v15  ;;  %2377 = vmatprep.subr.bf16.mxu0 %v3523_v43 }
  0xb5   : > { %2351 = vmatprep.mubr.msk.bf16.mxu1 %vm2855_vm0, %v3523_v43  ;;  %2420 = vmatpush3.bf16.msra.mxu1 %v2632_v9 }
  0xb6   : > { %2421 = vmatprep.subr.bf16.mxu1 %v3523_v43 }
  0xb7   : > { %2378 = vmatpush3.bf16.msra.mxu0 %v2625_v61 }
  0xb8   : > { %2379 = vmatprep.subr.bf16.mxu0 %v3523_v43 }
  0xb9   : > { %2422 = vmatpush3.bf16.msra.mxu1 %v2633_v10 }
  0xba   : > { %1108 = vmatmul.mubr.bf16.gmra.mxu0 %v432_v22  ;;  %2423 = vmatprep.subr.bf16.mxu1 %v3523_v43 }
  0xbb   : > { %1115 = vmatprep.mubr.bf16.mxu0 %v440_v23  ;;  %2380 = vmatpush3.bf16.msra.mxu0 %v2626_v1 }
  0xbc   : > { %2352 = vmatmul.mubr.msk.bf16.gmra.mxu1 %vm869_vm1, %v434_v24  ;;  %2381 = vmatprep.subr.bf16.mxu0 %v3523_v43 }
  0xbd   : > { %2355 = vmatprep.mubr.msk.bf16.mxu1 %vm2855_vm0, %v3523_v43  ;;  %2424 = vmatpush3.bf16.msra.mxu1 %v2634_v12 }
  0xbe   : > { %2425 = vmatprep.subr.bf16.mxu1 %v3523_v43 }
  0xbf   : > { %2382 = vmatpush3.bf16.msra.mxu0 %v2627_v4 }
  0xc0   : > { %2383 = vmatprep.subr.bf16.mxu0 %v3523_v43 }
  0xc1   : > { %2426 = vmatpush3.bf16.msra.mxu1 %v2635_v17 }
  0xc2   : > { %1116 = vmatmul.mubr.bf16.gmra.mxu0 %v439_v31 }
  0xc3   : > { %1123 = vmatprep.mubr.bf16.mxu0 %v447_v32  ;;  %2384 = vmatpush3.bf16.msra.mxu0 %v2628_v5 }
  0xc4   : > { %2356 = vmatmul.mubr.msk.bf16.gmra.mxu1 %vm869_vm1, %v441_v33  ;;  %2385 = vmatprep.subr.bf16.mxu0 %v3523_v43 }
  0xc5   : > { %2359 = vmatprep.mubr.msk.bf16.mxu1 %vm2855_vm0, %v3523_v43 }
  0xc7   : > { %2386 = vmatpush3.bf16.msra.mxu0 %v2629_v6 }
  0xc8   : > { %2387 = vmatprep.subr.bf16.mxu0 %v3523_v43 }
  0xca   : > { %1124 = vmatmul.mubr.bf16.gmra.mxu0 %v446_v40 }
  0xcb   : > { %1131 = vmatprep.mubr.bf16.mxu0 %v454_v41  ;;  %2388 = vmatpush3.bf16.msra.mxu0 %v2630_v7 }
  0xcc   : > { %2360 = vmatmul.mubr.msk.bf16.gmra.mxu1 %vm869_vm1, %v448_v42  ;;  %2389 = vmatprep.subr.bf16.mxu0 %v3523_v43 }
  0xcd   : > { %2363 = vmatprep.mubr.msk.bf16.mxu1 %vm2855_vm0, %v3523_v43 }
  0xcf   : > { %2390 = vmatpush3.bf16.msra.mxu0 %v2631_v8 }
  0xd2   : > { %1132 = vmatmul.mubr.bf16.gmra.mxu0 %v453_v50 }
  0xd3   : > { %1139 = vmatprep.mubr.bf16.mxu0 %v461_v51 }
  0xd4   : > { %2364 = vmatmul.mubr.msk.bf16.gmra.mxu1 %vm869_vm1, %v455_v52 }
  0xd5   : > { %2367 = vmatprep.mubr.msk.bf16.mxu1 %vm2855_vm0, %v3523_v43 }
  0xda   : > { %1140 = vmatmul.mubr.bf16.gmra.mxu0 %v460_v59 }
  0xdb   : > { %1147 = vmatprep.mubr.bf16.mxu0 %v468_v60 }
  0xdc   : > { %2368 = vmatmul.mubr.msk.bf16.gmra.mxu1 %vm869_vm1, %v462_v62 }
  0xdd   : > { %2371 = vmatprep.mubr.msk.bf16.mxu1 %vm2855_vm0, %v3523_v43 }
  0xe2   : > { %1148 = vmatmul.mubr.bf16.gmra.mxu0 %v467_v2  ;;  %v3271_v2 = vld [vmem:[%s3516_s2] ss:$0 sm:$0xff] }
  0xe3   : > { %2391 = vmatprep.mubr.msk.bf16.mxu0 %vm2855_vm0, %v3523_v43 }
  0xe4   : > { %2372 = vmatmul.mubr.msk.bf16.gmra.mxu1 %vm869_vm1, %v469_v3 }
  0xe5   : > { %2427 = vmatprep.mubr.msk.bf16.mxu1 %vm2855_vm0, %v3523_v43 }
 0x13a   : > { %v2153_v11 = vpop.f32.mrf.mxu0 }
 0x13c   : > { %v2211_v13 = vpop.f32.mrf.mxu1  ;;  %v2154_v14 = vpop.f32.mrf.mxu0 }
 0x13d   : > { %v2155_v1 = vadd.f32 %v2154_v14, %v2153_v11 }
 0x13e   : > { %v2212_v15 = vpop.f32.mrf.mxu1  ;;  %v2156_v16 = vpop.f32.mrf.mxu0 }
 0x13f   : > { %v926_v8 = vadd.f32 %v2155_v1, %v3271_v2  ;;  %v2213_v9 = vadd.f32 %v2212_v15, %v2211_v13 }
 0x140   : > { %v3188_v18 = vpop.f32.mrf.mxu1  ;;  %v2157_v19 = vpop.f32.mrf.mxu0 }
 0x141   : > { %v2158_v5 = vadd.f32 %v2157_v19, %v2156_v16  ;;  %v1014_v14 = vadd.f32 %v2213_v9, %v926_v8 }
 0x142   : > { %v2215_v20 = vpop.f32.mrf.mxu1  ;;  %v2159_v21 = vpop.f32.mrf.mxu0 }
 0x143   : > { %v929_v17 = vadd.f32 %v2158_v5, %v3271_v2 }
 0x144   : > { %v3190_v22 = vpop.f32.mrf.mxu1  ;;  %v2160_v23 = vpop.f32.mrf.mxu0 }
 0x146   : > { %v3192_v24 = vpop.f32.mrf.mxu1  ;;  %v2162_v25 = vpop.f32.mrf.mxu0 }
 0x147   : > { %v2219_v15 = vadd.f32 %v3192_v24, %v3190_v22 }
 0x148   : > { %v3194_v26 = vpop.f32.mrf.mxu1  ;;  %v2163_v27 = vpop.f32.mrf.mxu0 }
 0x149   : > { %v2164_v19 = vadd.f32 %v2163_v27, %v2162_v25 }
 0x14a   : > { %v3196_v28 = vpop.f32.mrf.mxu1  ;;  %v3198_v29 = vpop.f32.mrf.mxu0 }
 0x14c   : > { %v3200_v30 = vpop.f32.mrf.mxu1  ;;  %v3202_v31 = vpop.f32.mrf.mxu0 }
 0x14e   : > { %v3204_v32 = vpop.f32.mrf.mxu1  ;;  %v3206_v33 = vpop.f32.mrf.mxu0 }
 0x150   : > { %v3208_v34 = vpop.f32.mrf.mxu1  ;;  %v3210_v35 = vpop.f32.mrf.mxu0 }
 0x152   : > { %v3212_v36 = vpop.f32.mrf.mxu1  ;;  %v3214_v37 = vpop.f32.mrf.mxu0 }
 0x154   : > { %v3216_v38 = vpop.f32.mrf.mxu1  ;;  %v3218_v39 = vpop.f32.mrf.mxu0 }
 0x156   : > { %v3220_v40 = vpop.f32.mrf.mxu1  ;;  %v3222_v41 = vpop.f32.mrf.mxu0 }
 0x158   : > { %v3224_v42 = vpop.f32.mrf.mxu1  ;;  %v3226_v44 = vpop.f32.mrf.mxu0 }
 0x15a   : > { %v3228_v45 = vpop.f32.mrf.mxu1  ;;  %v3230_v46 = vpop.f32.mrf.mxu0 }
 0x15c   : > { %v3232_v47 = vpop.f32.mrf.mxu1  ;;  %v3234_v48 = vpop.f32.mrf.mxu0 }
 0x15e   : > { %v3236_v49 = vpop.f32.mrf.mxu1  ;;  %v3238_v50 = vpop.f32.mrf.mxu0 }
 0x160   : > { %v3240_v51 = vpop.f32.mrf.mxu1  ;;  %v3242_v52 = vpop.f32.mrf.mxu0 }
 0x162   : > { %v3244_v53 = vpop.f32.mrf.mxu1  ;;  %v3246_v54 = vpop.f32.mrf.mxu0 }
 0x164   : > { %v3248_v55 = vpop.f32.mrf.mxu1  ;;  %v3250_v56 = vpop.f32.mrf.mxu0 }
 0x166   : > { %v3252_v57 = vpop.f32.mrf.mxu1  ;;  %v3254_v58 = vpop.f32.mrf.mxu0 }
 0x168   : > { %v3256_v59 = vpop.f32.mrf.mxu1  ;;  %v3258_v60 = vpop.f32.mrf.mxu0 }
 0x169   : > { %3530 = vst [vmem:[#allocation10_spill] sm:$0xff] %v3256_v59  ;;  %v2216_v59 = vadd.f32 %v2215_v20, %v3188_v18  ;;  %v2167_v18 = vadd.f32 %v3202_v31, %v3198_v29  ;;  %v2225_v29 = vadd.f32 %v3204_v32, %v3200_v30  ;;  %v2170_v31 = vadd.f32 %v3210_v35, %v3206_v33 }
 0x16a   : > { %v3260_v61 = vpop.f32.mrf.mxu1  ;;  %v3262_v62 = vpop.f32.mrf.mxu0 }
 0x16b   : > { %3531 = vst [vmem:[#allocation11_spill] sm:$0xff] %v3260_v61  ;;  %v1017_v16 = vadd.f32 %v2216_v59, %v929_v17 }
 0x16c   : > { %v3264_v63 = vpop.f32.mrf.mxu1  ;;  %v3266_v0 = vpop.f32.mrf.mxu0 }
 0x16d   : > { %3532 = vst [vmem:[#allocation12_spill] sm:$0xff] %v3264_v63  ;;  %3533 = vst [vmem:[#allocation13_spill] sm:$0xff] %v3266_v0  ;;  %v2161_v63 = vadd.f32 %v2160_v23, %v2159_v21  ;;  %v937_v23 = vadd.f32 %v2164_v19, %v3271_v2 }
 0x16e   : > { %v3273_v3 = vpop.f32.mrf.mxu1  ;;  %v2192_v4 = vpop.f32.mrf.mxu0 }
 0x16f   : > { %3534 = vst [vmem:[#allocation14_spill] sm:$0xff] %v3273_v3  ;;  %v934_v13 = vadd.f32 %v2161_v63, %v3271_v2  ;;  %v2222_v63 = vadd.f32 %v3196_v28, %v3194_v26 }
 0x170   : > { %v2250_v6 = vpop.f32.mrf.mxu1  ;;  %v2193_v7 = vpop.f32.mrf.mxu0 }
 0x171   : > { %v1022_v25 = vadd.f32 %v2219_v15, %v934_v13  ;;  %v1025_v9 = vadd.f32 %v2222_v63, %v937_v23  ;;  %v945_v13 = vadd.f32 %v2170_v31, %v3271_v2  ;;  %v2173_v15 = vadd.f32 %v3218_v39, %v3214_v37 }
 0x172   : > { %v2251_v10 = vpop.f32.mrf.mxu1  ;;  %v2269_v12 = vpop.f32.mrf.mxu0 }
 0x173   : > { %v950_v39 = vadd.f32 %v2173_v15, %v3271_v2 }
 0x174   : > { %v1189_v43 = vpop.f32.mrf.mxu1  ;;  %v2270_v11 = vpop.f32.mrf.mxu0 }
 0x175   : > { %v2271_v61 = vadd.f32 %v2270_v11, %v2269_v12  ;;  %v942_v12 = vadd.f32 %v2167_v18, %v3271_v2 }
 0x176   : > { %v2349_v0 = vpop.f32.mrf.mxu1  ;;  %v2272_v3 = vpop.f32.mrf.mxu0 }
 0x177   : > { %v1102_v4 = vadd.f32 %v2271_v61, %v1014_v14  ;;  %v1030_v32 = vadd.f32 %v2225_v29, %v942_v12  ;;  %v2179_v12 = vadd.f32 %v3234_v48, %v3230_v46 }
 0x178   : > { %v1192_v6 = vpop.f32.mrf.mxu1  ;;  %v2273_v7 = vpop.f32.mrf.mxu0 }
 0x179   : > { %v1190_v1 = vadd.f32 %v1189_v43, %v1102_v4  ;;  %v2274_v5 = vadd.f32 %v2273_v7, %v2272_v3  ;;  %v958_v48 = vadd.f32 %v2179_v12, %v3271_v2 }
 0x17a   : > { %v2350_v10 = vpop.f32.mrf.mxu1  ;;  %v2275_v8 = vpop.f32.mrf.mxu0 }
 0x17b   : > { %v1105_v21 = vadd.f32 %v2274_v5, %v1017_v16  ;;  %v1256_v27 = vmul.f32 0.1, %v1190_v1  ;;  %vm1243_vm2 = vcmp.gt.f32.partialorder %v1190_v1, 0.0 }
 0x17c   : > { %v1197_v20 = vpop.f32.mrf.mxu1  ;;  %v2276_v59 = vpop.f32.mrf.mxu0 }
 0x17d   : > { %v1193_v61 = vadd.f32 %v1192_v6, %v1105_v21  ;;  %v2277_v0 = vadd.f32 %v2276_v59, %v2275_v8  ;;  %v1269_v14 = vsel %vm1243_vm2, %v1190_v1, %v1256_v27  ;;  %v3535_v1 = vmov 0.0  }
 0x17e   : > { %v2353_v43 = vpop.f32.mrf.mxu1  ;;  %v2278_v22 = vpop.f32.mrf.mxu0  ;;  %v2228_v8 = vadd.f32 %v3212_v36, %v3208_v34  ;;  %v2231_v59 = vadd.f32 %v3220_v40, %v3216_v38  ;;  %vm1533_vm2 = vcmask 523264  }
 0x17f   : > { %vm1244_vm3 = vcmp.gt.f32.partialorder %v1193_v61, 0.0  ;;  %v1257_v24 = vmul.f32 0.1, %v1193_v61  ;;  %v1110_v3 = vadd.f32 %v2277_v0, %v1022_v25  ;;  %v2176_v25 = vadd.f32 %v3226_v44, %v3222_v41 }
 0x180   : > { %v1200_v17 = vpop.f32.mrf.mxu1  ;;  %v2279_v11 = vpop.f32.mrf.mxu0  ;;  %v1033_v37 = vadd.f32 %v2228_v8, %v945_v13  ;;  %v1038_v40 = vadd.f32 %v2231_v59, %v950_v39  ;;  %v2243_v39 = vadd.f32 %v3252_v57, %v3248_v55  ;;  %v2188_v59 = vadd.f32 %v3258_v60, %v3254_v58 }
 0x181   : > { %v1270_v4 = vsel %vm1244_vm3, %v1193_v61, %v1257_v24  ;;  %v1198_v26 = vadd.f32 %v1197_v20, %v1110_v3  ;;  %v2280_v28 = vadd.f32 %v2279_v11, %v2278_v22 }
 0x182   : > { %v1282_v16 = vpack.c.bf16 %v1270_v4, %v1269_v14  ;;  %v2354_v19 = vpop.f32.mrf.mxu1  ;;  %v2281_v6 = vpop.f32.mrf.mxu0 }
 0x183   : > { %v1113_v7 = vadd.f32 %v2280_v28, %v1025_v9  ;;  %v1258_v33 = vmul.f32 0.1, %v1198_v26  ;;  %vm1245_vm4 = vcmp.gt.f32.partialorder %v1198_v26, 0.0  ;;  %v953_v9 = vadd.f32 %v2176_v25, %v3271_v2 }
 0x184   : > { %v1205_v5 = vpop.f32.mrf.mxu1  ;;  %v2282_v30 = vpop.f32.mrf.mxu0  ;;  %2392 = vmatmul.mubr.bf16.vlgmr.msra.gmra.mxu0 %v1282_v16  ;;  %v2237_v28 = vadd.f32 %v3236_v49, %v3232_v47  ;;  %v2182_v16 = vadd.f32 %v3242_v52, %v3238_v50 }
 0x185   : > { %v1201_v35 = vadd.f32 %v1200_v17, %v1113_v7  ;;  %v2283_v10 = vadd.f32 %v2282_v30, %v2281_v6  ;;  %2395 = vmatprep.mubr.msk.bf16.mxu0 %vm2855_vm0, %v3535_v1  ;;  %v1271_v34 = vsel %vm1245_vm4, %v1198_v26, %v1258_v33  ;;  %v2234_v17 = vadd.f32 %v3228_v45, %v3224_v42 }
 0x186   : > { %v2357_v21 = vpop.f32.mrf.mxu1  ;;  %v2284_v23 = vpop.f32.mrf.mxu0  ;;  %v961_v33 = vadd.f32 %v2182_v16, %v3271_v2  ;;  %v1046_v49 = vadd.f32 %v2237_v28, %v958_v48 }
 0x187   : > { %v1259_v18 = vmul.f32 0.1, %v1201_v35  ;;  %v1118_v20 = vadd.f32 %v2283_v10, %v1030_v32  ;;  %vm1246_vm5 = vcmp.gt.f32.partialorder %v1201_v35, 0.0  ;;  %v1041_v46 = vadd.f32 %v2234_v17, %v953_v9 }
 0x188   : > { %v1208_v27 = vpop.f32.mrf.mxu1  ;;  %v2285_v61 = vpop.f32.mrf.mxu0  ;;  %v2240_v21 = vadd.f32 %v3244_v53, %v3240_v51 }
 0x189   : > { %v1206_v0 = vadd.f32 %v1205_v5, %v1118_v20  ;;  %v2286_v63 = vadd.f32 %v2285_v61, %v2284_v23  ;;  %v1272_v36 = vsel %vm1246_vm5, %v1201_v35, %v1259_v18  ;;  %v2185_v35 = vadd.f32 %v3250_v56, %v3246_v54 }
 0x18a   : > { %v2358_v43 = vpop.f32.mrf.mxu1  ;;  %v2287_v22 = vpop.f32.mrf.mxu0  ;;  %v1283_v24 = vpack.c.bf16 %v1272_v36, %v1271_v34  ;;  %v1049_v54 = vadd.f32 %v2240_v21, %v961_v33 }
 0x18b   : > { %v1121_v3 = vadd.f32 %v2286_v63, %v1033_v37  ;;  %v1260_v41 = vmul.f32 0.1, %v1206_v0  ;;  %vm1247_vm6 = vcmp.gt.f32.partialorder %v1206_v0, 0.0  ;;  %v966_v56 = vadd.f32 %v2185_v35, %v3271_v2 }
 0x18c   : > { %v1213_v29 = vpop.f32.mrf.mxu1  ;;  %v2288_v38 = vpop.f32.mrf.mxu0  ;;  %2396 = vmatmul.mubr.bf16.gmra.mxu0 %v1283_v24  ;;  %v3536_v24 = vld [vmem:[#allocation13_spill] sm:$0xff] }
 0x18d   : > { %v1209_v44 = vadd.f32 %v1208_v27, %v1121_v3  ;;  %v2289_v31 = vadd.f32 %v2288_v38, %v2287_v22  ;;  %2399 = vmatprep.mubr.msk.bf16.mxu0 %vm2855_vm0, %v3535_v1  ;;  %v1273_v42 = vsel %vm1247_vm6, %v1206_v0, %v1260_v41  ;;  %v969_v22 = vadd.f32 %v2188_v59, %v3271_v2  ;;  %v3538_v38 = vld [vmem:[#allocation11_spill] sm:$0xff] }
 0x18e   : > { %v2361_v11 = vpop.f32.mrf.mxu1  ;;  %v2290_v14 = vpop.f32.mrf.mxu0  ;;  %v2191_v3 = vadd.f32 %v3536_v24, %v3262_v62  ;;  %v1054_v57 = vadd.f32 %v2243_v39, %v966_v56  ;;  %v3344_v39 = vld [vmem:[%s3518_s4] ss:$0 sm:$0xff] }
 0x18f   : > { %v1261_v4 = vmul.f32 0.1, %v1209_v44  ;;  %v1126_v26 = vadd.f32 %v2289_v31, %v1038_v40  ;;  %vm1248_vm7 = vcmp.gt.f32.partialorder %v1209_v44, 0.0 }
 0x190   : > { %v1216_v19 = vpop.f32.mrf.mxu1  ;;  %v2291_v6 = vpop.f32.mrf.mxu0  ;;  %v974_v11 = vadd.f32 %v2191_v3, %v3271_v2 }
 0x191   : > { %v1214_v7 = vadd.f32 %v1213_v29, %v1126_v26  ;;  %v2292_v13 = vadd.f32 %v2291_v6, %v2290_v14  ;;  %v1274_v45 = vsel %vm1248_vm7, %v1209_v44, %v1261_v4  ;;  %v3537_v29 = vld [vmem:[#allocation10_spill] sm:$0xff]  ;;  %v3539_v14 = vld [vmem:[#allocation12_spill] sm:$0xff] }
 0x192   : > { %v2362_v15 = vpop.f32.mrf.mxu1  ;;  %v2293_v5 = vpop.f32.mrf.mxu0  ;;  %v1284_v30 = vpack.c.bf16 %v1274_v45, %v1273_v42  ;;  %v2246_v40 = vadd.f32 %v3538_v38, %v3537_v29  ;;  %v3540_v4 = vld [vmem:[#allocation14_spill] sm:$0xff] }
 0x193   : > { %v1129_v32 = vadd.f32 %v2292_v13, %v1041_v46  ;;  %v1262_v50 = vmul.f32 0.1, %v1214_v7  ;;  %vm1249_vm8 = vcmp.gt.f32.partialorder %v1214_v7, 0.0  ;;  %v2249_v26 = vadd.f32 %v3540_v4, %v3539_v14 }
 0x194   : > { %v1221_v10 = vpop.f32.mrf.mxu1  ;;  %v2294_v47 = vpop.f32.mrf.mxu0  ;;  %2400 = vmatmul.mubr.bf16.gmra.mxu0 %v1284_v30  ;;  %v1057_v62 = vadd.f32 %v2246_v40, %v969_v22 }
 0x195   : > { %v1217_v52 = vadd.f32 %v1216_v19, %v1129_v32  ;;  %v2295_v8 = vadd.f32 %v2294_v47, %v2293_v5  ;;  %2403 = vmatprep.mubr.msk.bf16.mxu0 %vm2855_vm0, %v3535_v1  ;;  %v1275_v51 = vsel %vm1249_vm8, %v1214_v7, %v1262_v50  ;;  %v1062_v30 = vadd.f32 %v2249_v26, %v974_v11 }
 0x196   : > { %v2365_v23 = vpop.f32.mrf.mxu1  ;;  %v2296_v18 = vpop.f32.mrf.mxu0 }
 0x197   : > { %v1263_v20 = vmul.f32 0.1, %v1217_v52  ;;  %v1134_v37 = vadd.f32 %v2295_v8, %v1046_v49  ;;  %vm1250_vm9 = vcmp.gt.f32.partialorder %v1217_v52, 0.0 }
 0x198   : > { %v1224_v25 = vpop.f32.mrf.mxu1  ;;  %v2297_v27 = vpop.f32.mrf.mxu0 }
 0x199   : > { %v1222_v61 = vadd.f32 %v1221_v10, %v1134_v37  ;;  %v2298_v0 = vadd.f32 %v2297_v27, %v2296_v18  ;;  %v1276_v53 = vsel %vm1250_vm9, %v1217_v52, %v1263_v20 }
 0x19a   : > { %v2366_v63 = vpop.f32.mrf.mxu1  ;;  %v2299_v34 = vpop.f32.mrf.mxu0  ;;  %v1285_v36 = vpack.c.bf16 %v1276_v53, %v1275_v51 }
 0x19b   : > { %v1137_v43 = vadd.f32 %v2298_v0, %v1049_v54  ;;  %v1264_v58 = vmul.f32 0.1, %v1222_v61  ;;  %vm1251_vm10 = vcmp.gt.f32.partialorder %v1222_v61, 0.0 }
 0x19c   : > { %v1229_v9 = vpop.f32.mrf.mxu1  ;;  %v2300_v55 = vpop.f32.mrf.mxu0  ;;  %2404 = vmatmul.mubr.bf16.gmra.mxu0 %v1285_v36 }
 0x19d   : > { %v1225_v60 = vadd.f32 %v1224_v25, %v1137_v43  ;;  %v2301_v12 = vadd.f32 %v2300_v55, %v2299_v34  ;;  %2407 = vmatprep.mubr.msk.bf16.mxu0 %vm2855_vm0, %v3535_v1  ;;  %v1277_v19 = vsel %vm1251_vm10, %v1222_v61, %v1264_v58 }
 0x19e   : > { %v2369_v41 = vpop.f32.mrf.mxu1  ;;  %v2302_v44 = vpop.f32.mrf.mxu0 }
 0x19f   : > { %v1265_v31 = vmul.f32 0.1, %v1225_v60  ;;  %v1142_v17 = vadd.f32 %v2301_v12, %v1054_v57  ;;  %vm1252_vm11 = vcmp.gt.f32.partialorder %v1225_v60, 0.0 }
 0x1a0   : > { %v1232_v46 = vpop.f32.mrf.mxu1  ;;  %v2303_v48 = vpop.f32.mrf.mxu0 }
 0x1a1   : > { %v1230_v28 = vadd.f32 %v1229_v9, %v1142_v17  ;;  %v2304_v16 = vadd.f32 %v2303_v48, %v2302_v44  ;;  %v1278_v6 = vsel %vm1252_vm11, %v1225_v60, %v1265_v31 }
 0x1a2   : > { %v2370_v7 = vpop.f32.mrf.mxu1  ;;  %v2305_v13 = vpop.f32.mrf.mxu0  ;;  %v1286_v42 = vpack.c.bf16 %v1278_v6, %v1277_v19 }
 0x1a3   : > { %v1145_v45 = vadd.f32 %v2304_v16, %v1057_v62  ;;  %v1266_v32 = vmul.f32 0.1, %v1230_v28  ;;  %vm1253_vm12 = vcmp.gt.f32.partialorder %v1230_v28, 0.0 }
 0x1a4   : > { %v2306_v15 = vpop.f32.mrf.mxu0  ;;  %2408 = vmatmul.mubr.bf16.gmra.mxu0 %v1286_v42  ;;  %v1237_v5 = vpop.f32.mrf.mxu1 }
 0x1a5   : > { %v1233_v33 = vadd.f32 %v1232_v46, %v1145_v45  ;;  %v2307_v2 = vadd.f32 %v2306_v15, %v2305_v13  ;;  %2411 = vmatprep.mubr.msk.bf16.mxu0 %vm2855_vm0, %v3535_v1  ;;  %v1279_v21 = vsel %vm1253_vm12, %v1230_v28, %v1266_v32 }
 0x1a6   : > { %v2308_v35 = vpop.f32.mrf.mxu0  ;;  %v2373_v10 = vpop.f32.mrf.mxu1 }
 0x1a7   : > { %v1267_v47 = vmul.f32 0.1, %v1233_v33  ;;  %v1150_v49 = vadd.f32 %v2307_v2, %v1062_v30  ;;  %vm1254_vm13 = vcmp.gt.f32.partialorder %v1233_v33, 0.0 }
 0x1a8   : > { %v2309_v50 = vpop.f32.mrf.mxu0  ;;  %v1240_v52 = vpop.f32.mrf.mxu1 }
 0x1a9   : > { %v1238_v8 = vadd.f32 %v1237_v5, %v1150_v49  ;;  %v1280_v23 = vsel %vm1254_vm13, %v1233_v33, %v1267_v47 }
 0x1aa   : > { %v1287_v18 = vpack.c.bf16 %v1280_v23, %v1279_v21  ;;  %v2374_v20 = vpop.f32.mrf.mxu1 }
 0x1ab   : > { %v1268_v37 = vmul.f32 0.1, %v1238_v8  ;;  %vm1255_vm14 = vcmp.gt.f32.partialorder %v1238_v8, 0.0 }
 0x1ac   : > { %2412 = vmatmul.mubr.bf16.gmra.mxu0 %v1287_v18 }
 0x1ad   : > { %2415 = vmatprep.mubr.msk.bf16.mxu0 %vm2855_vm0, %v3535_v1  ;;  %v1281_v54 = vsel %vm1255_vm14, %v1238_v8, %v1268_v37 }
 0x1ae   : > { %v1288_v56 = vpack.c.bf16 %v1281_v54, %v1281_v54 }
 0x1b4   : > { %2416 = vmatmul.mubr.bf16.gmra.mxu0 %v1288_v56 }
 0x244   : > { %v1394_v59 = vpop.f32.mrf.mxu0 }
 0x245   : > { %v1395_v25 = vadd.f32 %v3344_v39, %v1394_v59 }
 0x246   : > { %v2393_v27 = vpop.f32.mrf.mxu0 }
 0x247   : > { %v1461_v0 = vmul.f32 0.1, %v1395_v25  ;;  %vm1448_vm15 = vcmp.gt.f32.partialorder %v1395_v25, 0.0 }
 0x248   : > { %v1397_v61 = vpop.f32.mrf.mxu0 }
 0x249   : > { %v1398_v51 = vadd.f32 %v3344_v39, %v1397_v61  ;;  %v1474_v36 = vsel %vm1448_vm15, %v1395_v25, %v1461_v0 }
 0x24a   : > { %v2394_v53 = vpop.f32.mrf.mxu0 }
 0x24b   : > { %vm1449_vm1 = vcmp.gt.f32.partialorder %v1398_v51, 0.0  ;;  %v1462_v63 = vmul.f32 0.1, %v1398_v51 }
 0x24c   : > { %v1402_v34 = vpop.f32.mrf.mxu0 }
 0x24d   : > { %v1475_v43 = vsel %vm1449_vm1, %v1398_v51, %v1462_v63  ;;  %v1403_v22 = vadd.f32 %v3344_v39, %v1402_v34 }
 0x24e   : > { %v1487_v24 = vpack.c.bf16 %v1475_v43, %v1474_v36  ;;  %v2397_v3 = vpop.f32.mrf.mxu0 }
 0x24f   : > { %v1463_v55 = vmul.f32 0.1, %v1403_v22  ;;  %vm1450_vm3 = vcmp.gt.f32.partialorder %v1403_v22, 0.0 }
 0x250   : > { %v1405_v9 = vpop.f32.mrf.mxu0  ;;  %2428 = vmatmul.mubr.msk.bf16.vlgmr.msra.gmra.mxu1 %vm1533_vm2, %v1487_v24  ;;  %v3378_v24 = vld [vmem:[#allocation2] ss:$0 sm:$0xff] }
 0x251   : > { %v1406_v57 = vadd.f32 %v3344_v39, %v1405_v9  ;;  %2431 = vmatprep.mubr.msk.bf16.mxu1 %vm2855_vm0, %v3535_v1  ;;  %v1476_v29 = vsel %vm1450_vm3, %v1403_v22, %v1463_v55 }
 0x252   : > { %v2398_v58 = vpop.f32.mrf.mxu0 }
 0x253   : > { %vm1451_vm4 = vcmp.gt.f32.partialorder %v1406_v57, 0.0  ;;  %v1464_v60 = vmul.f32 0.1, %v1406_v57 }
 0x254   : > { %v1410_v12 = vpop.f32.mrf.mxu0 }
 0x255   : > { %v1477_v38 = vsel %vm1451_vm4, %v1406_v57, %v1464_v60  ;;  %v1411_v40 = vadd.f32 %v3344_v39, %v1410_v12 }
 0x256   : > { %v1488_v41 = vpack.c.bf16 %v1477_v38, %v1476_v29  ;;  %v2401_v44 = vpop.f32.mrf.mxu0 }
 0x257   : > { %v1465_v17 = vmul.f32 0.1, %v1411_v40  ;;  %vm1452_vm5 = vcmp.gt.f32.partialorder %v1411_v40, 0.0 }
 0x258   : > { %v1413_v31 = vpop.f32.mrf.mxu0  ;;  %2432 = vmatmul.mubr.msk.bf16.gmra.mxu1 %vm1533_vm2, %v1488_v41 }
 0x259   : > { %v1414_v62 = vadd.f32 %v3344_v39, %v1413_v31  ;;  %2435 = vmatprep.mubr.msk.bf16.mxu1 %vm2855_vm0, %v3535_v1  ;;  %v1478_v26 = vsel %vm1452_vm5, %v1411_v40, %v1465_v17 }
 0x25a   : > { %v2402_v11 = vpop.f32.mrf.mxu0 }
 0x25b   : > { %vm1453_vm6 = vcmp.gt.f32.partialorder %v1414_v62, 0.0  ;;  %v1466_v14 = vmul.f32 0.1, %v1414_v62 }
 0x25c   : > { %v1418_v4 = vpop.f32.mrf.mxu0 }
 0x25d   : > { %v1479_v46 = vsel %vm1453_vm6, %v1414_v62, %v1466_v14  ;;  %v1419_v48 = vadd.f32 %v3344_v39, %v1418_v4 }
 0x25e   : > { %v1489_v28 = vpack.c.bf16 %v1479_v46, %v1478_v26  ;;  %v2405_v16 = vpop.f32.mrf.mxu0 }
 0x25f   : > { %v1467_v6 = vmul.f32 0.1, %v1419_v48  ;;  %vm1454_vm7 = vcmp.gt.f32.partialorder %v1419_v48, 0.0 }
 0x260   : > { %v1421_v19 = vpop.f32.mrf.mxu0  ;;  %2436 = vmatmul.mubr.msk.bf16.gmra.mxu1 %vm1533_vm2, %v1489_v28 }
 0x261   : > { %v1422_v7 = vadd.f32 %v3344_v39, %v1421_v19  ;;  %2439 = vmatprep.mubr.msk.bf16.mxu1 %vm2855_vm0, %v3535_v1  ;;  %v1480_v15 = vsel %vm1454_vm7, %v1419_v48, %v1467_v6 }
 0x262   : > { %v2406_v13 = vpop.f32.mrf.mxu0 }
 0x263   : > { %vm1455_vm8 = vcmp.gt.f32.partialorder %v1422_v7, 0.0  ;;  %v1468_v42 = vmul.f32 0.1, %v1422_v7 }
 0x264   : > { %v1426_v45 = vpop.f32.mrf.mxu0 }
 0x265   : > { %v1481_v5 = vsel %vm1455_vm8, %v1422_v7, %v1468_v42  ;;  %v1427_v30 = vadd.f32 %v3344_v39, %v1426_v45 }
 0x266   : > { %v1490_v32 = vpack.c.bf16 %v1481_v5, %v1480_v15  ;;  %v2409_v33 = vpop.f32.mrf.mxu0 }
 0x267   : > { %v1469_v35 = vmul.f32 0.1, %v1427_v30  ;;  %vm1456_vm9 = vcmp.gt.f32.partialorder %v1427_v30, 0.0 }
 0x268   : > { %v1429_v2 = vpop.f32.mrf.mxu0  ;;  %2440 = vmatmul.mubr.msk.bf16.gmra.mxu1 %vm1533_vm2, %v1490_v32 }
 0x269   : > { %v1430_v10 = vadd.f32 %v3344_v39, %v1429_v2  ;;  %2443 = vmatprep.mubr.msk.bf16.mxu1 %vm2855_vm0, %v3535_v1  ;;  %v1482_v52 = vsel %vm1456_vm9, %v1427_v30, %v1469_v35 }
 0x26a   : > { %v2410_v47 = vpop.f32.mrf.mxu0 }
 0x26b   : > { %vm1457_vm10 = vcmp.gt.f32.partialorder %v1430_v10, 0.0  ;;  %v1470_v49 = vmul.f32 0.1, %v1430_v10 }
 0x26c   : > { %v1434_v50 = vpop.f32.mrf.mxu0 }
 0x26d   : > { %v1483_v8 = vsel %vm1457_vm10, %v1430_v10, %v1470_v49  ;;  %v1435_v21 = vadd.f32 %v3344_v39, %v1434_v50 }
 0x26e   : > { %v1491_v23 = vpack.c.bf16 %v1483_v8, %v1482_v52  ;;  %v2413_v18 = vpop.f32.mrf.mxu0 }
 0x26f   : > { %v1471_v37 = vmul.f32 0.1, %v1435_v21  ;;  %vm1458_vm11 = vcmp.gt.f32.partialorder %v1435_v21, 0.0 }
 0x270   : > { %v1437_v20 = vpop.f32.mrf.mxu0  ;;  %2444 = vmatmul.mubr.msk.bf16.gmra.mxu1 %vm1533_vm2, %v1491_v23 }
 0x271   : > { %v1438_v54 = vadd.f32 %v3344_v39, %v1437_v20  ;;  %2447 = vmatprep.mubr.msk.bf16.mxu1 %vm2855_vm0, %v3535_v1  ;;  %v1484_v27 = vsel %vm1458_vm11, %v1435_v21, %v1471_v37 }
 0x272   : > { %v2414_v56 = vpop.f32.mrf.mxu0 }
 0x273   : > { %vm1459_vm12 = vcmp.gt.f32.partialorder %v1438_v54, 0.0  ;;  %v1472_v59 = vmul.f32 0.1, %v1438_v54 }
 0x274   : > { %v1442_v25 = vpop.f32.mrf.mxu0 }
 0x275   : > { %v1485_v61 = vsel %vm1459_vm12, %v1438_v54, %v1472_v59  ;;  %v1443_v0 = vadd.f32 %v3344_v39, %v1442_v25 }
 0x276   : > { %v1492_v51 = vpack.c.bf16 %v1485_v61, %v1484_v27  ;;  %v2417_v53 = vpop.f32.mrf.mxu0 }
 0x277   : > { %v1473_v63 = vmul.f32 0.1, %v1443_v0  ;;  %vm1460_vm13 = vcmp.gt.f32.partialorder %v1443_v0, 0.0 }
 0x278   : > { %v1445_v34 = vpop.f32.mrf.mxu0  ;;  %2448 = vmatmul.mubr.msk.bf16.gmra.mxu1 %vm1533_vm2, %v1492_v51 }
 0x279   : > { %2451 = vmatprep.mubr.msk.bf16.mxu1 %vm2855_vm0, %v3535_v1  ;;  %v1486_v43 = vsel %vm1460_vm13, %v1443_v0, %v1473_v63  ;;  %vm1721_vm0 = vcmask 7168  }
 0x27a   : > { %v2418_v36 = vpop.f32.mrf.mxu0  ;;  %v1493_v22 = vpack.c.bf16 %v1486_v43, %v1486_v43 }
 0x280   : > { %2452 = vmatmul.mubr.msk.bf16.gmra.mxu1 %vm1533_vm2, %v1493_v22 }
 0x310   : > { %v1589_v3 = vpop.f32.mrf.mxu1 }
 0x311   : > { %v1590_v39 = vadd.f32 %v3378_v24, %v1589_v3 }
 0x312   : > { %v2429_v9 = vpop.f32.mrf.mxu1 }
 0x313   : > { %v2111_v55 = vmul.f32 -1.442695, %v1590_v39 }
 0x314   : > { %v1592_v57 = vpop.f32.mrf.mxu1 }
 0x315   : > { %2636 = vpow2.f32 %v2111_v55  ;;  %v1593_v58 = vadd.f32 %v3378_v24, %v1592_v57 }
 0x316   : > { %v2430_v60 = vpop.f32.mrf.mxu1 }
 0x317   : > { %v2112_v12 = vmul.f32 -1.442695, %v1593_v58 }
 0x318   : > { %v1597_v29 = vpop.f32.mrf.mxu1 }
 0x319   : > { %2638 = vpow2.f32 %v2112_v12  ;;  %v1598_v1 = vadd.f32 %v3378_v24, %v1597_v29 }
 0x31a   : > { %v2433_v38 = vpop.f32.mrf.mxu1 }
 0x31b   : > { %v2113_v40 = vmul.f32 -1.442695, %v1598_v1 }
 0x31c   : > { %v1600_v41 = vpop.f32.mrf.mxu1 }
 0x31d   : > { %2640 = vpow2.f32 %v2113_v40  ;;  %v1601_v44 = vadd.f32 %v3378_v24, %v1600_v41 }
 0x31e   : > { %v2434_v31 = vpop.f32.mrf.mxu1 }
 0x31f   : > { %v2114_v17 = vmul.f32 -1.442695, %v1601_v44 }
 0x320   : > { %v1605_v62 = vpop.f32.mrf.mxu1 }
 0x321   : > { %2642 = vpow2.f32 %v2114_v17  ;;  %v1606_v11 = vadd.f32 %v3378_v24, %v1605_v62 }
 0x322   : > { %v2637_v14 = vpop.eup %2636  ;;  %v2437_v4 = vpop.f32.mrf.mxu1 }
 0x323   : > { %v1682_v26 = vadd.f32 1.0, %v2637_v14  ;;  %v2115_v46 = vmul.f32 -1.442695, %v1606_v11 }
 0x324   : > { %v1608_v48 = vpop.f32.mrf.mxu1 }
 0x325   : > { %2644 = vrcp.f32 %v1682_v26  ;;  %v1609_v28 = vadd.f32 %v3378_v24, %v1608_v48 }
 0x326   : > { %v2639_v16 = vpop.eup %2638  ;;  %2646 = vpow2.f32 %v2115_v46  ;;  %v2438_v19 = vpop.f32.mrf.mxu1 }
 0x327   : > { %v1683_v6 = vadd.f32 1.0, %v2639_v16  ;;  %v2116_v7 = vmul.f32 -1.442695, %v1609_v28 }
 0x328   : > { %v1613_v13 = vpop.f32.mrf.mxu1 }
 0x329   : > { %2648 = vrcp.f32 %v1683_v6  ;;  %v1614_v42 = vadd.f32 %v3378_v24, %v1613_v13 }
 0x32a   : > { %v2641_v45 = vpop.eup %2640  ;;  %2650 = vpow2.f32 %v2116_v7  ;;  %v2441_v15 = vpop.f32.mrf.mxu1 }
 0x32b   : > { %v1684_v5 = vadd.f32 1.0, %v2641_v45  ;;  %v2117_v30 = vmul.f32 -1.442695, %v1614_v42 }
 0x32c   : > { %v1616_v32 = vpop.f32.mrf.mxu1 }
 0x32d   : > { %2652 = vrcp.f32 %v1684_v5  ;;  %v1617_v33 = vadd.f32 %v3378_v24, %v1616_v32 }
 0x32e   : > { %v2643_v2 = vpop.eup %2642  ;;  %2654 = vpow2.f32 %v2117_v30  ;;  %v2442_v35 = vpop.f32.mrf.mxu1 }
 0x32f   : > { %v1685_v10 = vadd.f32 1.0, %v2643_v2  ;;  %v2118_v47 = vmul.f32 -1.442695, %v1617_v33 }
 0x330   : > { %v1621_v49 = vpop.f32.mrf.mxu1 }
 0x331   : > { %2656 = vrcp.f32 %v1685_v10  ;;  %v1622_v50 = vadd.f32 %v3378_v24, %v1621_v49 }
 0x332   : > { %v2645_v52 = vpop.eup %2644  ;;  %2658 = vpow2.f32 %v2118_v47  ;;  %v2445_v8 = vpop.f32.mrf.mxu1 }
 0x333   : > { %v2647_v21 = vpop.eup %2646  ;;  %1722 = vst.msk [vmem:[%s3390_s17] sm:$0xff] %vm1721_vm0, %v2645_v52  ;;  %v2119_v23 = vmul.f32 -1.442695, %v1622_v50 }
 0x334   : > { %v1686_v18 = vadd.f32 1.0, %v2647_v21  ;;  %v1624_v20 = vpop.f32.mrf.mxu1 }
 0x335   : > { %2660 = vpow2.f32 %v2119_v23  ;;  %v1625_v37 = vadd.f32 %v3378_v24, %v1624_v20 }
 0x336   : > { %v2649_v54 = vpop.eup %2648  ;;  %2662 = vrcp.f32 %v1686_v18  ;;  %v2446_v56 = vpop.f32.mrf.mxu1 }
 0x337   : > { %v2651_v59 = vpop.eup %2650  ;;  %1723 = vst.msk [vmem:[%s3390_s17 + $0x8] sm:$0xff] %vm1721_vm0, %v2649_v54  ;;  %v2120_v25 = vmul.f32 -1.442695, %v1625_v37 }
 0x338   : > { %v1687_v27 = vadd.f32 1.0, %v2651_v59  ;;  %v1629_v61 = vpop.f32.mrf.mxu1 }
 0x339   : > { %2664 = vpow2.f32 %v2120_v25  ;;  %v1630_v0 = vadd.f32 %v3378_v24, %v1629_v61 }
 0x33a   : > { %v2653_v51 = vpop.eup %2652  ;;  %2666 = vrcp.f32 %v1687_v27  ;;  %v2449_v53 = vpop.f32.mrf.mxu1 }
 0x33b   : > { %v2655_v63 = vpop.eup %2654  ;;  %1724 = vst.msk [vmem:[%s3390_s17 + $0x10] sm:$0xff] %vm1721_vm0, %v2653_v51  ;;  %v2121_v34 = vmul.f32 -1.442695, %v1630_v0 }
 0x33c   : > { %v1688_v36 = vadd.f32 1.0, %v2655_v63  ;;  %v1632_v43 = vpop.f32.mrf.mxu1 }
 0x33d   : > { %2668 = vpow2.f32 %v2121_v34  ;;  %v1633_v22 = vadd.f32 %v3378_v24, %v1632_v43 }
 0x33e   : > { %v2657_v3 = vpop.eup %2656  ;;  %2670 = vrcp.f32 %v1688_v36  ;;  %v2450_v39 = vpop.f32.mrf.mxu1 }
 0x33f   : > { %v2659_v9 = vpop.eup %2658  ;;  %1725 = vst.msk [vmem:[%s3390_s17 + $0x18] sm:$0xff] %vm1721_vm0, %v2657_v3  ;;  %v2122_v55 = vmul.f32 -1.442695, %v1633_v22 }
 0x340   : > { %v1689_v57 = vadd.f32 1.0, %v2659_v9  ;;  %v1637_v58 = vpop.f32.mrf.mxu1 }
 0x341   : > { %2672 = vpow2.f32 %v2122_v55  ;;  %v1638_v60 = vadd.f32 %v3378_v24, %v1637_v58 }
 0x342   : > { %v2661_v12 = vpop.eup %2660  ;;  %2674 = vrcp.f32 %v1689_v57  ;;  %v2453_v29 = vpop.f32.mrf.mxu1 }
 0x343   : > { %v2663_v1 = vpop.eup %2662  ;;  %v1690_v38 = vadd.f32 1.0, %v2661_v12  ;;  %v2123_v40 = vmul.f32 -1.442695, %v1638_v60 }
 0x344   : > { %1726 = vst.msk [vmem:[%s3390_s17 + $0x20] sm:$0xff] %vm1721_vm0, %v2663_v1  ;;  %v1640_v41 = vpop.f32.mrf.mxu1 }
 0x345   : > { %2676 = vrcp.f32 %v1690_v38 }
 0x346   : > { %v2665_v44 = vpop.eup %2664  ;;  %2678 = vpow2.f32 %v2123_v40  ;;  %v2454_v31 = vpop.f32.mrf.mxu1 }
 0x347   : > { %v2667_v17 = vpop.eup %2666  ;;  %v1691_v62 = vadd.f32 1.0, %v2665_v44 }
 0x348   : > { %1727 = vst.msk [vmem:[%s3390_s17 + $0x28] sm:$0xff] %vm1721_vm0, %v2667_v17 }
 0x349   : > { %2680 = vrcp.f32 %v1691_v62 }
 0x34a   : > { %v2669_v24 = vpop.eup %2668 }
 0x34b   : > { %v2671_v11 = vpop.eup %2670  ;;  %v1692_v14 = vadd.f32 1.0, %v2669_v24 }
 0x34c   : > { %1728 = vst.msk [vmem:[%s3390_s17 + $0x30] sm:$0xff] %vm1721_vm0, %v2671_v11 }
 0x34d   : > { %2682 = vrcp.f32 %v1692_v14 }
 0x34e   : > { %v2673_v4 = vpop.eup %2672 }
 0x34f   : > { %v2675_v26 = vpop.eup %2674  ;;  %v1693_v46 = vadd.f32 1.0, %v2673_v4 }
 0x350   : > { %1729 = vst.msk [vmem:[%s3390_s17 + $0x38] sm:$0xff] %vm1721_vm0, %v2675_v26 }
 0x351   : > { %2684 = vrcp.f32 %v1693_v46 }
 0x352   : > { %v2677_v48 = vpop.eup %2676 }
 0x353   : > { %v2679_v28 = vpop.eup %2678  ;;  %1730 = vst.msk [vmem:[%s3390_s17 + $0x40] sm:$0xff] %vm1721_vm0, %v2677_v48 }
 0x354   : > { %v1694_v16 = vadd.f32 1.0, %v2679_v28 }
 0x356   : > { %v2681_v19 = vpop.eup %2680  ;;  %2686 = vrcp.f32 %v1694_v16 }
 0x357   : > { %1731 = vst.msk [vmem:[%s3390_s17 + $0x48] sm:$0xff] %vm1721_vm0, %v2681_v19 }
 0x35a   : > { %v2683_v6 = vpop.eup %2682 }
 0x35b   : > { %1732 = vst.msk [vmem:[%s3390_s17 + $0x50] sm:$0xff] %vm1721_vm0, %v2683_v6 }
 0x35e   : > { %v2685_v7 = vpop.eup %2684 }
 0x35f   : > { %1733 = vst.msk [vmem:[%s3390_s17 + $0x58] sm:$0xff] %vm1721_vm0, %v2685_v7 }
 0x360   : > { %1741 = sbr.rel (!%p3541_p5) target bundleno = 922 (0x39a), region = 60 }
 0x363   : > { %v2687_v13 = vpop.eup %2686 }
 0x364   : > { %1734 = vst.msk [vmem:[%s3390_s17 + $0x60] sm:$0xff] %vm1721_vm0, %v2687_v13 }
 0x365   : > { %s3552_s21 = smov (!%p1744_p11, %s1743_s21), 13 }
 0x366   : > { %s2124_s14 = sshll.u32 %s3552_s21, 7 }
 0x367   : > { %p2127_p4 = scmp.eq.s32.totalorder %s2124_s14, 0 }
 0x368   : > { %2688 = sdivrem.u32 (!%p2127_p4), %s3552_s21, 13 }
 0x369   : > { %1752 = sbr.rel (%p2127_p4) target bundleno = 922 (0x39a), region = 64 }
 0x371   : > { %s3435_s13 = spop.drf %2688 }
 0x372   : > { %p2128_p2 = scmp.le.s32.totalorder %s3435_s13, 0 }
 0x373   : > { %s3542_s6 = smov (!%p2128_p2), %s3429_s12  ;;  %s3543_s26 = smov (!%p2128_p2), %s3390_s17 }
 0x374   : > { %1966 = sbr.rel (%p2128_p2) target bundleno = 897 (0x381), region = 146  ;;  %s3444_s9 = smov (!%p2128_p2), 0  }
 0x375   : > { %s3446_s16 = smov (!%p2128_p2), 0  }
 0x379 LB: >> { %v1841_v42 = vld [vmem:[%s2822_s26] sm:$0xff]  ;;  %v1843_v45 = vld [vmem:[%s2822_s26 + $0x8] sm:$0xff]  ;;  %v1845_v15 = vld [vmem:[%s2822_s26 + $0x10] sm:$0xff]  ;;  %s1867_s19 = sadd.s32 1, %s2826_s9  ;;  %s1835_s16 = sadd.s32 1, %s2830_s16   ;;  %s2830_s16 = sphi %s3446_s16, %s1835_s16   ;;  %s2826_s9 = sphi %s3444_s9, %s3544_s9   ;;  %s2822_s26 = sphi %s3543_s26, %s1872_s26   ;;  %s2818_s6 = sphi %s3542_s6, %s1873_s6  }
 0x37a   : >> { %1842 = vst [vmem:[%s2818_s6] sm:$0xff] %v1841_v42  ;;  %1844 = vst [vmem:[%s2818_s6 + $0x8] sm:$0xff] %v1843_v45  ;;  %v1847_v5 = vld [vmem:[%s2822_s26 + $0x18] sm:$0xff]  ;;  %v1849_v30 = vld [vmem:[%s2822_s26 + $0x20] sm:$0xff]  ;;  %p1868_p3 = scmp.ge.s32.totalorder %s1867_s19, %s3435_s13  ;;  %p1834_p1 = scmp.ge.s32.totalorder %s1835_s16, %s3435_s13 }
 0x37b   : >> { %1846 = vst [vmem:[%s2818_s6 + $0x10] sm:$0xff] %v1845_v15  ;;  %v1851_v32 = vld [vmem:[%s2822_s26 + $0x28] sm:$0xff]  ;;  %1848 = vst [vmem:[%s2818_s6 + $0x18] sm:$0xff] %v1847_v5  ;;  %v1853_v33 = vld [vmem:[%s2822_s26 + $0x30] sm:$0xff] }
 0x37c   : >> { %1850 = vst [vmem:[%s2818_s6 + $0x20] sm:$0xff] %v1849_v30  ;;  %1852 = vst [vmem:[%s2818_s6 + $0x28] sm:$0xff] %v1851_v32  ;;  %v1855_v2 = vld [vmem:[%s2822_s26 + $0x38] sm:$0xff]  ;;  %v1857_v35 = vld [vmem:[%s2822_s26 + $0x40] sm:$0xff]  ;;  %s3554_s19 = smov (%p1868_p3, %s1867_s19), 0  ;;  %1837 = sbr.rel (!%p1834_p1) target bundleno = 889 (0x379), region = 152 }
 0x37d   : >> { %1854 = vst [vmem:[%s2818_s6 + $0x30] sm:$0xff] %v1853_v33  ;;  %1856 = vst [vmem:[%s2818_s6 + $0x38] sm:$0xff] %v1855_v2  ;;  %v1859_v10 = vld [vmem:[%s2822_s26 + $0x48] sm:$0xff]  ;;  %v1861_v47 = vld [vmem:[%s2822_s26 + $0x50] sm:$0xff]  ;;  %s1870_s23 = smul.u32 104, %s3554_s19  ;;  %s3544_s9 = smov %s3554_s19 }
 0x37e   : >> { %1858 = vst [vmem:[%s2818_s6 + $0x40] sm:$0xff] %v1857_v35  ;;  %v1863_v49 = vld [vmem:[%s2822_s26 + $0x58] sm:$0xff]  ;;  %1860 = vst [vmem:[%s2818_s6 + $0x48] sm:$0xff] %v1859_v10  ;;  %v1865_v50 = vld [vmem:[%s2822_s26 + $0x60] sm:$0xff] }
 0x37f   : >> { %1862 = vst [vmem:[%s2818_s6 + $0x50] sm:$0xff] %v1861_v47  ;;  %1864 = vst [vmem:[%s2818_s6 + $0x58] sm:$0xff] %v1863_v49  ;;  %s1872_s26 = scalar_lea.vmem %s3390_s17, %s1870_s23 [#allocation7]  }
 0x380   : >> { %1866 = vst [vmem:[%s2818_s6 + $0x60] sm:$0xff] %v1865_v50  ;;  %s1873_s6 = scalar_lea.vmem %s3429_s12, %s1870_s23  }
 0x381 PF: > { %2690 = sdivrem.u32 %s3552_s21, 13 }
 0x382   : > { %s2129_s24 = smul.u32 104, %s3435_s13 }
 0x384   : > { %s1878_s25 = scalar_lea.vmem %s3390_s17, %s2129_s24 [#allocation7]   ;;  %s1880_s8 = scalar_lea.vmem %s3429_s12, %s2129_s24  }
 0x38a   : > { %s2691_s15 = spop.drf %2690 }
 0x38b   : > { %p2131_p6 = scmp.le.s32.totalorder %s2691_s15, 0 }
 0x38c   : > { %s2832_s11 = smov (!%p2131_p6), %s1880_s8   ;;  %s2836_s20 = smov (!%p2131_p6), %s1878_s25  }
 0x38d   : > { %1980 = sbr.rel (%p2131_p6) target bundleno = 922 (0x39a), region = 157  ;;  %s2840_s18 = smov (!%p2131_p6), 0  }
 0x38e   : > { %s2844_s22 = smov (!%p2131_p6), 0  }
 0x392 LB: >> { %v1890_v52 = vld [vmem:[%s2838_s20] sm:$0xff]  ;;  %s1892_s29 = sadd.s32 1, %s2842_s18  ;;  %s1884_s22 = sadd.s32 1, %s2846_s22   ;;  %s2846_s22 = sphi %s2844_s22, %s1884_s22   ;;  %s2842_s18 = sphi %s2840_s18, %s2841_s18   ;;  %s2838_s20 = sphi %s2836_s20, %s1897_s20   ;;  %s2834_s11 = sphi %s2832_s11, %s1898_s11  }
 0x393   : >> { %1891 = vst [vmem:[%s2834_s11] sm:$0xff] %v1890_v52  ;;  %p1893_p7 = scmp.ge.s32.totalorder %s1892_s29, %s2691_s15  ;;  %p1883_p9 = scmp.ge.s32.totalorder %s1884_s22, %s2691_s15 }
 0x395   : >> { %s3556_s29 = smov (%p1893_p7, %s1892_s29), 0  ;;  %1886 = sbr.rel (!%p1883_p9) target bundleno = 914 (0x392), region = 163 }
 0x396   : >> { %s2132_s17 = sshll.u32 %s3556_s29, 3  ;;  %s2841_s18 = smov %s3556_s29  }
 0x397   : >> { %s1897_s20 = scalar_lea.vmem %s1878_s25, %s2132_s17 [#allocation7]   ;;  %s1898_s11 = scalar_lea.vmem %s1880_s8, %s2132_s17  }
 0x39a PF: > { %p20_p8 = scmp.ge.s32.totalorder %s2921_s30, 4   ;;  %s3545_s26 = smov %s2806_s27 }
 0x39b   : > { %s3546_s27 = smov %s2810_s28  ;;  %s3547_s28 = smov %s2931_s10 }
 0x39c   : > { %s3548_s29 = smov %s2921_s30  ;;  %22 = sbr.rel (!%p20_p8) target bundleno = 7 (0x7), region = 174 }
 0x3a1   :  { %1914 = vsyncpa [#allocation4], 1 }
 0x3a2   :  { %1916 = vsyncpa [#allocation4 + $0x1], 1 }
 0x3a3   :  { %1917 = vsyncpa [#allocation6], 1 }

</bundles_post_ra>
